<compile_context>
chip_gen: v7x
topology: tpu7x:2x2x1
jax: 0.10.0
libtpu: 0.0.40
codegen_flags: <defaults>
</compile_context>

<pallas_src>
import jax
import jax.numpy as jnp
from jax.experimental import pallas as pl
from jax.experimental.pallas import tpu as pltpu

_LPAD = 8  # sublane-aligned halo width of the padded conv scratch (W axis)


def _fill_padded(pad_ref, interior):
    """Zero the halo (rows 0 / hp+1, left/right _LPAD columns) and store `interior`."""
    hp, wp = interior.shape[0], interior.shape[1]
    w2, c = pad_ref.shape[1], pad_ref.shape[2]
    dt = pad_ref.dtype
    pad_ref[0, :, :] = jnp.zeros((w2, c), dt)                             # top halo row
    pad_ref[hp + 1, :, :] = jnp.zeros((w2, c), dt)                        # bottom halo row
    pad_ref[1:hp + 1, 0:_LPAD, :] = jnp.zeros((hp, _LPAD, c), dt)         # left halo cols
    pad_ref[1:hp + 1, _LPAD + wp:w2, :] = jnp.zeros((hp, _LPAD, c), dt)   # right halo cols
    pad_ref[1:hp + 1, _LPAD:_LPAD + wp, :] = interior.astype(dt)          # interior


def _conv3x3(pad_ref, w_ref, hp, wp):
    """3x3 'same' conv as 9 shifted (hp*wp, Cin) @ (Cin, Cout) bf16 MXU matmuls (f32 acc)."""
    cin = pad_ref.shape[2]
    cout = w_ref.shape[3]
    acc = jnp.zeros((hp * wp, cout), jnp.float32)
    for dy in range(3):
        wide = pad_ref[dy:dy + hp, :, :]          # ONE aligned load per row tap
        for dx in range(3):
            off = _LPAD - 1 + dx                  # dx=+-1 taps: in-register shifts of `wide`
            patch = wide[:, off:off + wp, :].reshape(hp * wp, cin)
            acc = acc + jnp.dot(patch.astype(jnp.bfloat16), w_ref[dy, dx],
                                preferred_element_type=jnp.float32)
    return acc


def downsample_kernel(x_ref, w1_ref, s1_ref, b1_ref, w2_ref, s2_ref, b2_ref,
                      o_ref, pad1_ref, pad2_ref):
    # x_ref  : (1, Hp, 2, Wp, 2*Cin) packed NHWC input (dim 2 = h-phase, channel halves = w-phase)
    # w*_ref : (3, 3, C, Cout) bf16 HWIO;  s*/b*_ref: (1, Cout) folded BN scale / bias (f32)
    # o_ref  : (1, Hp, Wp, Cout)
    # pad*_ref: (Hp+2, Wp+2*_LPAD, C) f32 zero-halo conv scratch
    hp, wp, cout = o_ref.shape[1], o_ref.shape[2], o_ref.shape[3]
    cin = pad1_ref.shape[2]

    # ---- MaxPool2d(2): max over h-phase planes, then over w-phase channel halves ----
    xa = x_ref[0, :, 0, :, :]                       # (Hp, Wp, 2*Cin)  h-even rows
    xb = x_ref[0, :, 1, :, :]                       # h-odd rows
    m = jnp.maximum(xa, xb)
    pooled = jnp.maximum(m[:, :, :cin], m[:, :, cin:])   # (Hp, Wp, Cin)

    # ---- Conv1 (3x3, pad=1, no bias) -> folded BN -> ReLU ----
    _fill_padded(pad1_ref, pooled)
    acc1 = _conv3x3(pad1_ref, w1_ref, hp, wp)
    y1 = jnp.maximum(acc1 * s1_ref[...] + b1_ref[...], 0.0)

    # ---- Conv2 (3x3, pad=1, no bias) -> folded BN -> ReLU ----
    _fill_padded(pad2_ref, y1.reshape(hp, wp, cout))
    acc2 = _conv3x3(pad2_ref, w2_ref, hp, wp)
    y2 = jnp.maximum(acc2 * s2_ref[...] + b2_ref[...], 0.0)

    o_ref[0] = y2.reshape(hp, wp, cout).astype(o_ref.dtype)


def downsample(x_nchw,
               w1_oihw, bn1_gamma, bn1_beta, bn1_mean, bn1_var,
               w2_oihw, bn2_gamma, bn2_beta, bn2_mean, bn2_var,
               eps=1e-5):
    """DownSample forward. x_nchw: (B, Cin, H, W) -> (B, Cout, H//2, W//2)."""
    B, Cin, H, W = x_nchw.shape
    Cout = w1_oihw.shape[0]
    assert H % 2 == 0 and W % 2 == 0, "MaxPool2d(2) needs even H, W"
    Hp, Wp = H // 2, W // 2
    assert Wp % 8 == 0, "pooled width must be a multiple of 8 (f32 sublane tile)"

    # Single NHWC pass; the pool-phase packing below is a free row-major reshape
    # (no extra HBM traffic, no decimated copies).
    x = jnp.transpose(x_nchw, (0, 2, 3, 1)).reshape(B, Hp, 2, Wp, 2 * Cin)

    w1 = jnp.transpose(w1_oihw, (2, 3, 1, 0)).astype(jnp.bfloat16)   # (3,3,Cin,Cout) HWIO bf16
    w2 = jnp.transpose(w2_oihw, (2, 3, 1, 0)).astype(jnp.bfloat16)   # (3,3,Cout,Cout)

    s1 = (bn1_gamma / jnp.sqrt(bn1_var + eps)).reshape(1, Cout).astype(jnp.float32)
    b1 = (bn1_beta - bn1_mean * s1[0]).reshape(1, Cout).astype(jnp.float32)
    s2 = (bn2_gamma / jnp.sqrt(bn2_var + eps)).reshape(1, Cout).astype(jnp.float32)
    b2 = (bn2_beta - bn2_mean * s2[0]).reshape(1, Cout).astype(jnp.float32)

    # ---- VMEM budget from the actual block / scratch sizes (review #7) ----
    f32 = 4
    in_block = H * W * Cin * f32
    out_block = Hp * Wp * Cout * f32
    param_bytes = (9 * Cin * Cout + 9 * Cout * Cout) * 2 + 4 * Cout * f32
    scratch_bytes = (Hp + 2) * (Wp + 2 * _LPAD) * (Cin + Cout) * f32
    live_bytes = 4 * Hp * Wp * max(2 * Cin, Cout) * f32          # pooled / accumulator headroom
    needed = 2 * (in_block + out_block + param_bytes) + scratch_bytes + live_bytes
    try:
        vmem_cap = int(pltpu.get_tpu_info().vmem_capacity_bytes * 3 // 4)
    except Exception:
        vmem_cap = 48 * 1024 * 1024                              # safe on v5e / v6e / v7x
    vmem_limit = int(min(max(2 * needed, 16 * 1024 * 1024), vmem_cap))

    flops = 2 * B * Hp * Wp * 9 * (Cin * Cout + Cout * Cout)
    bytes_accessed = (B * H * W * Cin + B * Hp * Wp * Cout) * f32 + param_bytes

    out_nhwc = pl.pallas_call(
        downsample_kernel,
        out_shape=jax.ShapeDtypeStruct((B, Hp, Wp, Cout), x_nchw.dtype),
        grid_spec=pltpu.PrefetchScalarGridSpec(
            num_scalar_prefetch=0,
            grid=(B,),
            in_specs=[
                pl.BlockSpec((1, Hp, 2, Wp, 2 * Cin), lambda b: (b, 0, 0, 0, 0)),
                pl.BlockSpec((3, 3, Cin, Cout), lambda b: (0, 0, 0, 0)),
                pl.BlockSpec((1, Cout), lambda b: (0, 0)),
                pl.BlockSpec((1, Cout), lambda b: (0, 0)),
                pl.BlockSpec((3, 3, Cout, Cout), lambda b: (0, 0, 0, 0)),
                pl.BlockSpec((1, Cout), lambda b: (0, 0)),
                pl.BlockSpec((1, Cout), lambda b: (0, 0)),
            ],
            out_specs=pl.BlockSpec((1, Hp, Wp, Cout), lambda b: (b, 0, 0, 0)),
            scratch_shapes=[
                pltpu.VMEM((Hp + 2, Wp + 2 * _LPAD, Cin), jnp.float32),
                pltpu.VMEM((Hp + 2, Wp + 2 * _LPAD, Cout), jnp.float32),
            ],
        ),
        compiler_params=pltpu.CompilerParams(
            dimension_semantics=("parallel",),
            vmem_limit_bytes=vmem_limit,
        ),
        cost_estimate=pl.CostEstimate(flops=flops, transcendentals=0,
                                      bytes_accessed=bytes_accessed),
    )(x, w1, s1, b1, w2, s2, b2)

    return jnp.transpose(out_nhwc, (0, 3, 1, 2))                 # back to NCHW


if __name__ == "__main__":
    # Small shapes consistent with the module: batch=2, in_ch=4, out_ch=8, spatial=16x16.
    B, Cin, Cout, H, W = 2, 4, 8, 16, 16
    eps = 1e-5
    key = jax.random.PRNGKey(0)
    (kx, kw1, kw2, kg1, kb1, km1, kv1, kg2, kb2, km2, kv2) = jax.random.split(key, 11)

    x = jax.random.normal(kx, (B, Cin, H, W), dtype=jnp.float32)

    bound1 = 1.0 / (Cin * 9) ** 0.5
    w1 = jax.random.uniform(kw1, (Cout, Cin, 3, 3), jnp.float32, -bound1, bound1)
    bound2 = 1.0 / (Cout * 9) ** 0.5
    w2 = jax.random.uniform(kw2, (Cout, Cout, 3, 3), jnp.float32, -bound2, bound2)

    g1 = jax.random.uniform(kg1, (Cout,), jnp.float32, 0.5, 1.5)
    be1 = 0.1 * jax.random.normal(kb1, (Cout,), jnp.float32)
    m1 = 0.1 * jax.random.normal(km1, (Cout,), jnp.float32)
    v1 = jax.random.uniform(kv1, (Cout,), jnp.float32, 0.5, 1.5)
    g2 = jax.random.uniform(kg2, (Cout,), jnp.float32, 0.5, 1.5)
    be2 = 0.1 * jax.random.normal(kb2, (Cout,), jnp.float32)
    m2 = 0.1 * jax.random.normal(km2, (Cout,), jnp.float32)
    v2 = jax.random.uniform(kv2, (Cout,), jnp.float32, 0.5, 1.5)

    out = downsample(x, w1, g1, be1, m1, v1, w2, g2, be2, m2, v2, eps=eps)
    jax.block_until_ready(out)
    assert out.shape == (B, Cout, H // 2, W // 2)

    # ---- Plain-JAX references (same inference-mode BN semantics) ----
    xn = jnp.transpose(x, (0, 2, 3, 1))
    pooled = xn.reshape(B, H // 2, 2, W // 2, 2, Cin).max(axis=(2, 4))

    def conv3x3(inp, w_oihw, op_dtype):
        w_hwio = jnp.transpose(w_oihw, (2, 3, 1, 0)).astype(op_dtype)
        return jax.lax.conv_general_dilated(
            inp.astype(op_dtype), w_hwio, window_strides=(1, 1),
            padding=((1, 1), (1, 1)),
            dimension_numbers=("NHWC", "HWIO", "NHWC"),
            preferred_element_type=jnp.float32)

    def bn_relu(inp, g, b, m, v):
        return jnp.maximum((inp - m) / jnp.sqrt(v + eps) * g + b, 0.0)

    def reference(op_dtype):
        r = bn_relu(conv3x3(pooled, w1, op_dtype), g1, be1, m1, v1)
        r = bn_relu(conv3x3(r, w2, op_dtype), g2, be2, m2, v2)
        return jnp.transpose(r, (0, 3, 1, 2))

    ref_matched = reference(jnp.bfloat16)   # same bf16-operand / f32-accumulate math as the kernel
    ref_f32 = reference(jnp.float32)        # full-precision sanity check

    assert jnp.allclose(out, ref_matched, atol=5e-3, rtol=5e-3), \
        float(jnp.max(jnp.abs(out - ref_matched)))
    assert jnp.allclose(out, ref_f32, atol=5e-2, rtol=5e-2), \
        float(jnp.max(jnp.abs(out - ref_f32)))
    print("KERNEL_OK")
</pallas_src>

<mosaic_0001>
module attributes {stable_mosaic.version = 11 : i64} {
  func.func @downsample_kernel(%arg0: i32, %arg1: memref<1x8x2x8x8xf32, #tpu.memory_space<vmem>>, %arg2: memref<3x3x4x8xbf16, #tpu.memory_space<vmem>>, %arg3: memref<1x8xf32, #tpu.memory_space<vmem>>, %arg4: memref<1x8xf32, #tpu.memory_space<vmem>>, %arg5: memref<3x3x8x8xbf16, #tpu.memory_space<vmem>>, %arg6: memref<1x8xf32, #tpu.memory_space<vmem>>, %arg7: memref<1x8xf32, #tpu.memory_space<vmem>>, %arg8: memref<1x8x8x8xf32, #tpu.memory_space<vmem>>, %arg9: memref<10x24x4xf32, #tpu.memory_space<vmem>>, %arg10: memref<10x24x8xf32, #tpu.memory_space<vmem>>) attributes {dimension_semantics = [#tpu.dimension_semantics<parallel>], iteration_bounds = array<i64: 2>, scalar_prefetch = 0 : i64, scratch_operands = 2 : i64, tpu.core_type = #tpu.core_type<tc>, window_params = [{transform_indices = @transform_0, window_bounds = array<i64: 1, 8, 2, 8, 8>}, {pipeline_mode = #tpu.pipeline_mode<synchronous>, transform_indices = @transform_1, window_bounds = array<i64: 3, 3, 4, 8>}, {pipeline_mode = #tpu.pipeline_mode<synchronous>, transform_indices = @transform_2, window_bounds = array<i64: 1, 8>}, {pipeline_mode = #tpu.pipeline_mode<synchronous>, transform_indices = @transform_3, window_bounds = array<i64: 1, 8>}, {pipeline_mode = #tpu.pipeline_mode<synchronous>, transform_indices = @transform_4, window_bounds = array<i64: 3, 3, 8, 8>}, {pipeline_mode = #tpu.pipeline_mode<synchronous>, transform_indices = @transform_5, window_bounds = array<i64: 1, 8>}, {pipeline_mode = #tpu.pipeline_mode<synchronous>, transform_indices = @transform_6, window_bounds = array<i64: 1, 8>}, {transform_indices = @transform_7, window_bounds = array<i64: 1, 8, 8, 8>}]} {
    %c0 = arith.constant 0 : index
    %c0_0 = arith.constant 0 : index
    %c0_1 = arith.constant 0 : index
    %c0_2 = arith.constant 0 : index
    %c0_3 = arith.constant 0 : index
    %0 = vector.load %arg1[%c0, %c0_0, %c0_1, %c0_2, %c0_3] : memref<1x8x2x8x8xf32, #tpu.memory_space<vmem>>, vector<1x8x1x8x8xf32>
    %1 = vector.shape_cast %0 : vector<1x8x1x8x8xf32> to vector<8x8x8xf32>
    %c0_4 = arith.constant 0 : index
    %c0_5 = arith.constant 0 : index
    %c1 = arith.constant 1 : index
    %c0_6 = arith.constant 0 : index
    %c0_7 = arith.constant 0 : index
    %2 = vector.load %arg1[%c0_4, %c0_5, %c1, %c0_6, %c0_7] : memref<1x8x2x8x8xf32, #tpu.memory_space<vmem>>, vector<1x8x1x8x8xf32>
    %3 = vector.shape_cast %2 : vector<1x8x1x8x8xf32> to vector<8x8x8xf32>
    %4 = arith.maximumf %1, %3 : vector<8x8x8xf32>
    %5 = vector.extract_strided_slice %4 {offsets = [0, 0, 0], sizes = [8, 8, 4], strides = [1, 1, 1]} : vector<8x8x8xf32> to vector<8x8x4xf32>
    %6 = vector.extract_strided_slice %4 {offsets = [0, 0, 4], sizes = [8, 8, 4], strides = [1, 1, 1]} : vector<8x8x8xf32> to vector<8x8x4xf32>
    %7 = arith.maximumf %5, %6 : vector<8x8x4xf32>
    %cst = arith.constant 0.000000e+00 : f32
    %8 = vector.broadcast %cst : f32 to vector<24x4xf32>
    %c0_8 = arith.constant 0 : index
    %c0_9 = arith.constant 0 : index
    %c0_10 = arith.constant 0 : index
    %9 = vector.load %arg9[%c0_8, %c0_9, %c0_10] : memref<10x24x4xf32, #tpu.memory_space<vmem>>, vector<1x24x4xf32>
    %10 = vector.shape_cast %9 : vector<1x24x4xf32> to vector<24x4xf32>
    %11 = vector.shape_cast %8 : vector<24x4xf32> to vector<1x24x4xf32>
    tpu.vector_store %arg9[%c0_8, %c0_9, %c0_10], %11 {strides = array<i32>} : memref<10x24x4xf32, #tpu.memory_space<vmem>>, vector<1x24x4xf32>,
    %cst_11 = arith.constant 0.000000e+00 : f32
    %12 = vector.broadcast %cst_11 : f32 to vector<24x4xf32>
    %c9 = arith.constant 9 : index
    %c0_12 = arith.constant 0 : index
    %c0_13 = arith.constant 0 : index
    %13 = vector.load %arg9[%c9, %c0_12, %c0_13] : memref<10x24x4xf32, #tpu.memory_space<vmem>>, vector<1x24x4xf32>
    %14 = vector.shape_cast %13 : vector<1x24x4xf32> to vector<24x4xf32>
    %15 = vector.shape_cast %12 : vector<24x4xf32> to vector<1x24x4xf32>
    tpu.vector_store %arg9[%c9, %c0_12, %c0_13], %15 {strides = array<i32>} : memref<10x24x4xf32, #tpu.memory_space<vmem>>, vector<1x24x4xf32>,
    %cst_14 = arith.constant 0.000000e+00 : f32
    %16 = vector.broadcast %cst_14 : f32 to vector<8x8x4xf32>
    %c1_15 = arith.constant 1 : index
    %c0_16 = arith.constant 0 : index
    %c0_17 = arith.constant 0 : index
    %17 = vector.load %arg9[%c1_15, %c0_16, %c0_17] : memref<10x24x4xf32, #tpu.memory_space<vmem>>, vector<8x8x4xf32>
    tpu.vector_store %arg9[%c1_15, %c0_16, %c0_17], %16 {strides = array<i32>} : memref<10x24x4xf32, #tpu.memory_space<vmem>>, vector<8x8x4xf32>,
    %cst_18 = arith.constant 0.000000e+00 : f32
    %18 = vector.broadcast %cst_18 : f32 to vector<8x8x4xf32>
    %c1_19 = arith.constant 1 : index
    %c16 = arith.constant 16 : index
    %c0_20 = arith.constant 0 : index
    %19 = vector.load %arg9[%c1_19, %c16, %c0_20] : memref<10x24x4xf32, #tpu.memory_space<vmem>>, vector<8x8x4xf32>
    tpu.vector_store %arg9[%c1_19, %c16, %c0_20], %18 {strides = array<i32>} : memref<10x24x4xf32, #tpu.memory_space<vmem>>, vector<8x8x4xf32>,
    %c1_21 = arith.constant 1 : index
    %c8 = arith.constant 8 : index
    %c0_22 = arith.constant 0 : index
    %20 = vector.load %arg9[%c1_21, %c8, %c0_22] : memref<10x24x4xf32, #tpu.memory_space<vmem>>, vector<8x8x4xf32>
    tpu.vector_store %arg9[%c1_21, %c8, %c0_22], %7 {strides = array<i32>} : memref<10x24x4xf32, #tpu.memory_space<vmem>>, vector<8x8x4xf32>,
    %cst_23 = arith.constant 0.000000e+00 : f32
    %21 = vector.broadcast %cst_23 : f32 to vector<64x8xf32>
    %c0_24 = arith.constant 0 : index
    %c0_25 = arith.constant 0 : index
    %c0_26 = arith.constant 0 : index
    %22 = vector.load %arg9[%c0_24, %c0_25, %c0_26] : memref<10x24x4xf32, #tpu.memory_space<vmem>>, vector<8x24x4xf32>
    %23 = vector.extract_strided_slice %22 {offsets = [0, 7, 0], sizes = [8, 8, 4], strides = [1, 1, 1]} : vector<8x24x4xf32> to vector<8x8x4xf32>
    %24 = vector.shape_cast %23 : vector<8x8x4xf32> to vector<64x4xf32>
    %25 = arith.truncf %24 : vector<64x4xf32> to vector<64x4xbf16>
    %c0_27 = arith.constant 0 : index
    %c0_28 = arith.constant 0 : index
    %c0_29 = arith.constant 0 : index
    %c0_30 = arith.constant 0 : index
    %26 = vector.load %arg2[%c0_27, %c0_28, %c0_29, %c0_30] : memref<3x3x4x8xbf16, #tpu.memory_space<vmem>>, vector<1x1x4x8xbf16>
    %27 = vector.shape_cast %26 : vector<1x1x4x8xbf16> to vector<4x8xbf16>
    %cst_31 = arith.constant dense<0.000000e+00> : vector<64x8xf32>
    %28 = tpu.matmul %25, %27, %cst_31 {dimension_numbers = #tpu.dot_dimension_numbers<[1], [0], [0], [1], [0, 0, 1, 1], [], []>} : vector<64x4xbf16>, vector<4x8xbf16>, vector<64x8xf32> -> vector<64x8xf32>
    %29 = arith.addf %21, %28 : vector<64x8xf32>
    %30 = vector.extract_strided_slice %22 {offsets = [0, 8, 0], sizes = [8, 8, 4], strides = [1, 1, 1]} : vector<8x24x4xf32> to vector<8x8x4xf32>
    %31 = vector.shape_cast %30 : vector<8x8x4xf32> to vector<64x4xf32>
    %32 = arith.truncf %31 : vector<64x4xf32> to vector<64x4xbf16>
    %c0_32 = arith.constant 0 : index
    %c1_33 = arith.constant 1 : index
    %c0_34 = arith.constant 0 : index
    %c0_35 = arith.constant 0 : index
    %33 = vector.load %arg2[%c0_32, %c1_33, %c0_34, %c0_35] : memref<3x3x4x8xbf16, #tpu.memory_space<vmem>>, vector<1x1x4x8xbf16>
    %34 = vector.shape_cast %33 : vector<1x1x4x8xbf16> to vector<4x8xbf16>
    %cst_36 = arith.constant dense<0.000000e+00> : vector<64x8xf32>
    %35 = tpu.matmul %32, %34, %cst_36 {dimension_numbers = #tpu.dot_dimension_numbers<[1], [0], [0], [1], [0, 0, 1, 1], [], []>} : vector<64x4xbf16>, vector<4x8xbf16>, vector<64x8xf32> -> vector<64x8xf32>
    %36 = arith.addf %29, %35 : vector<64x8xf32>
    %37 = vector.extract_strided_slice %22 {offsets = [0, 9, 0], sizes = [8, 8, 4], strides = [1, 1, 1]} : vector<8x24x4xf32> to vector<8x8x4xf32>
    %38 = vector.shape_cast %37 : vector<8x8x4xf32> to vector<64x4xf32>
    %39 = arith.truncf %38 : vector<64x4xf32> to vector<64x4xbf16>
    %c0_37 = arith.constant 0 : index
    %c2 = arith.constant 2 : index
    %c0_38 = arith.constant 0 : index
    %c0_39 = arith.constant 0 : index
    %40 = vector.load %arg2[%c0_37, %c2, %c0_38, %c0_39] : memref<3x3x4x8xbf16, #tpu.memory_space<vmem>>, vector<1x1x4x8xbf16>
    %41 = vector.shape_cast %40 : vector<1x1x4x8xbf16> to vector<4x8xbf16>
    %cst_40 = arith.constant dense<0.000000e+00> : vector<64x8xf32>
    %42 = tpu.matmul %39, %41, %cst_40 {dimension_numbers = #tpu.dot_dimension_numbers<[1], [0], [0], [1], [0, 0, 1, 1], [], []>} : vector<64x4xbf16>, vector<4x8xbf16>, vector<64x8xf32> -> vector<64x8xf32>
    %43 = arith.addf %36, %42 : vector<64x8xf32>
    %c1_41 = arith.constant 1 : index
    %c0_42 = arith.constant 0 : index
    %c0_43 = arith.constant 0 : index
    %44 = vector.load %arg9[%c1_41, %c0_42, %c0_43] : memref<10x24x4xf32, #tpu.memory_space<vmem>>, vector<8x24x4xf32>
    %45 = vector.extract_strided_slice %44 {offsets = [0, 7, 0], sizes = [8, 8, 4], strides = [1, 1, 1]} : vector<8x24x4xf32> to vector<8x8x4xf32>
    %46 = vector.shape_cast %45 : vector<8x8x4xf32> to vector<64x4xf32>
    %47 = arith.truncf %46 : vector<64x4xf32> to vector<64x4xbf16>
    %c1_44 = arith.constant 1 : index
    %c0_45 = arith.constant 0 : index
    %c0_46 = arith.constant 0 : index
    %c0_47 = arith.constant 0 : index
    %48 = vector.load %arg2[%c1_44, %c0_45, %c0_46, %c0_47] : memref<3x3x4x8xbf16, #tpu.memory_space<vmem>>, vector<1x1x4x8xbf16>
    %49 = vector.shape_cast %48 : vector<1x1x4x8xbf16> to vector<4x8xbf16>
    %cst_48 = arith.constant dense<0.000000e+00> : vector<64x8xf32>
    %50 = tpu.matmul %47, %49, %cst_48 {dimension_numbers = #tpu.dot_dimension_numbers<[1], [0], [0], [1], [0, 0, 1, 1], [], []>} : vector<64x4xbf16>, vector<4x8xbf16>, vector<64x8xf32> -> vector<64x8xf32>
    %51 = arith.addf %43, %50 : vector<64x8xf32>
    %52 = vector.extract_strided_slice %44 {offsets = [0, 8, 0], sizes = [8, 8, 4], strides = [1, 1, 1]} : vector<8x24x4xf32> to vector<8x8x4xf32>
    %53 = vector.shape_cast %52 : vector<8x8x4xf32> to vector<64x4xf32>
    %54 = arith.truncf %53 : vector<64x4xf32> to vector<64x4xbf16>
    %c1_49 = arith.constant 1 : index
    %c1_50 = arith.constant 1 : index
    %c0_51 = arith.constant 0 : index
    %c0_52 = arith.constant 0 : index
    %55 = vector.load %arg2[%c1_49, %c1_50, %c0_51, %c0_52] : memref<3x3x4x8xbf16, #tpu.memory_space<vmem>>, vector<1x1x4x8xbf16>
    %56 = vector.shape_cast %55 : vector<1x1x4x8xbf16> to vector<4x8xbf16>
    %cst_53 = arith.constant dense<0.000000e+00> : vector<64x8xf32>
    %57 = tpu.matmul %54, %56, %cst_53 {dimension_numbers = #tpu.dot_dimension_numbers<[1], [0], [0], [1], [0, 0, 1, 1], [], []>} : vector<64x4xbf16>, vector<4x8xbf16>, vector<64x8xf32> -> vector<64x8xf32>
    %58 = arith.addf %51, %57 : vector<64x8xf32>
    %59 = vector.extract_strided_slice %44 {offsets = [0, 9, 0], sizes = [8, 8, 4], strides = [1, 1, 1]} : vector<8x24x4xf32> to vector<8x8x4xf32>
    %60 = vector.shape_cast %59 : vector<8x8x4xf32> to vector<64x4xf32>
    %61 = arith.truncf %60 : vector<64x4xf32> to vector<64x4xbf16>
    %c1_54 = arith.constant 1 : index
    %c2_55 = arith.constant 2 : index
    %c0_56 = arith.constant 0 : index
    %c0_57 = arith.constant 0 : index
    %62 = vector.load %arg2[%c1_54, %c2_55, %c0_56, %c0_57] : memref<3x3x4x8xbf16, #tpu.memory_space<vmem>>, vector<1x1x4x8xbf16>
    %63 = vector.shape_cast %62 : vector<1x1x4x8xbf16> to vector<4x8xbf16>
    %cst_58 = arith.constant dense<0.000000e+00> : vector<64x8xf32>
    %64 = tpu.matmul %61, %63, %cst_58 {dimension_numbers = #tpu.dot_dimension_numbers<[1], [0], [0], [1], [0, 0, 1, 1], [], []>} : vector<64x4xbf16>, vector<4x8xbf16>, vector<64x8xf32> -> vector<64x8xf32>
    %65 = arith.addf %58, %64 : vector<64x8xf32>
    %c2_59 = arith.constant 2 : index
    %c0_60 = arith.constant 0 : index
    %c0_61 = arith.constant 0 : index
    %66 = vector.load %arg9[%c2_59, %c0_60, %c0_61] : memref<10x24x4xf32, #tpu.memory_space<vmem>>, vector<8x24x4xf32>
    %67 = vector.extract_strided_slice %66 {offsets = [0, 7, 0], sizes = [8, 8, 4], strides = [1, 1, 1]} : vector<8x24x4xf32> to vector<8x8x4xf32>
    %68 = vector.shape_cast %67 : vector<8x8x4xf32> to vector<64x4xf32>
    %69 = arith.truncf %68 : vector<64x4xf32> to vector<64x4xbf16>
    %c2_62 = arith.constant 2 : index
    %c0_63 = arith.constant 0 : index
    %c0_64 = arith.constant 0 : index
    %c0_65 = arith.constant 0 : index
    %70 = vector.load %arg2[%c2_62, %c0_63, %c0_64, %c0_65] : memref<3x3x4x8xbf16, #tpu.memory_space<vmem>>, vector<1x1x4x8xbf16>
    %71 = vector.shape_cast %70 : vector<1x1x4x8xbf16> to vector<4x8xbf16>
    %cst_66 = arith.constant dense<0.000000e+00> : vector<64x8xf32>
    %72 = tpu.matmul %69, %71, %cst_66 {dimension_numbers = #tpu.dot_dimension_numbers<[1], [0], [0], [1], [0, 0, 1, 1], [], []>} : vector<64x4xbf16>, vector<4x8xbf16>, vector<64x8xf32> -> vector<64x8xf32>
    %73 = arith.addf %65, %72 : vector<64x8xf32>
    %74 = vector.extract_strided_slice %66 {offsets = [0, 8, 0], sizes = [8, 8, 4], strides = [1, 1, 1]} : vector<8x24x4xf32> to vector<8x8x4xf32>
    %75 = vector.shape_cast %74 : vector<8x8x4xf32> to vector<64x4xf32>
    %76 = arith.truncf %75 : vector<64x4xf32> to vector<64x4xbf16>
    %c2_67 = arith.constant 2 : index
    %c1_68 = arith.constant 1 : index
    %c0_69 = arith.constant 0 : index
    %c0_70 = arith.constant 0 : index
    %77 = vector.load %arg2[%c2_67, %c1_68, %c0_69, %c0_70] : memref<3x3x4x8xbf16, #tpu.memory_space<vmem>>, vector<1x1x4x8xbf16>
    %78 = vector.shape_cast %77 : vector<1x1x4x8xbf16> to vector<4x8xbf16>
    %cst_71 = arith.constant dense<0.000000e+00> : vector<64x8xf32>
    %79 = tpu.matmul %76, %78, %cst_71 {dimension_numbers = #tpu.dot_dimension_numbers<[1], [0], [0], [1], [0, 0, 1, 1], [], []>} : vector<64x4xbf16>, vector<4x8xbf16>, vector<64x8xf32> -> vector<64x8xf32>
    %80 = arith.addf %73, %79 : vector<64x8xf32>
    %81 = vector.extract_strided_slice %66 {offsets = [0, 9, 0], sizes = [8, 8, 4], strides = [1, 1, 1]} : vector<8x24x4xf32> to vector<8x8x4xf32>
    %82 = vector.shape_cast %81 : vector<8x8x4xf32> to vector<64x4xf32>
    %83 = arith.truncf %82 : vector<64x4xf32> to vector<64x4xbf16>
    %c2_72 = arith.constant 2 : index
    %c2_73 = arith.constant 2 : index
    %c0_74 = arith.constant 0 : index
    %c0_75 = arith.constant 0 : index
    %84 = vector.load %arg2[%c2_72, %c2_73, %c0_74, %c0_75] : memref<3x3x4x8xbf16, #tpu.memory_space<vmem>>, vector<1x1x4x8xbf16>
    %85 = vector.shape_cast %84 : vector<1x1x4x8xbf16> to vector<4x8xbf16>
    %cst_76 = arith.constant dense<0.000000e+00> : vector<64x8xf32>
    %86 = tpu.matmul %83, %85, %cst_76 {dimension_numbers = #tpu.dot_dimension_numbers<[1], [0], [0], [1], [0, 0, 1, 1], [], []>} : vector<64x4xbf16>, vector<4x8xbf16>, vector<64x8xf32> -> vector<64x8xf32>
    %87 = arith.addf %80, %86 : vector<64x8xf32>
    %c0_77 = arith.constant 0 : index
    %c0_78 = arith.constant 0 : index
    %88 = vector.load %arg3[%c0_77, %c0_78] : memref<1x8xf32, #tpu.memory_space<vmem>>, vector<1x8xf32>
    %89 = vector.broadcast %88 : vector<1x8xf32> to vector<64x8xf32>
    %90 = arith.mulf %87, %89 : vector<64x8xf32>
    %c0_79 = arith.constant 0 : index
    %c0_80 = arith.constant 0 : index
    %91 = vector.load %arg4[%c0_79, %c0_80] : memref<1x8xf32, #tpu.memory_space<vmem>>, vector<1x8xf32>
    %92 = vector.broadcast %91 : vector<1x8xf32> to vector<64x8xf32>
    %93 = arith.addf %90, %92 : vector<64x8xf32>
    %cst_81 = arith.constant 0.000000e+00 : f32
    %94 = vector.broadcast %cst_81 : f32 to vector<64x8xf32>
    %95 = arith.maximumf %93, %94 : vector<64x8xf32>
    %96 = vector.shape_cast %95 : vector<64x8xf32> to vector<8x8x8xf32>
    %cst_82 = arith.constant 0.000000e+00 : f32
    %97 = vector.broadcast %cst_82 : f32 to vector<24x8xf32>
    %c0_83 = arith.constant 0 : index
    %c0_84 = arith.constant 0 : index
    %c0_85 = arith.constant 0 : index
    %98 = vector.load %arg10[%c0_83, %c0_84, %c0_85] : memref<10x24x8xf32, #tpu.memory_space<vmem>>, vector<1x24x8xf32>
    %99 = vector.shape_cast %98 : vector<1x24x8xf32> to vector<24x8xf32>
    %100 = vector.shape_cast %97 : vector<24x8xf32> to vector<1x24x8xf32>
    tpu.vector_store %arg10[%c0_83, %c0_84, %c0_85], %100 {strides = array<i32>} : memref<10x24x8xf32, #tpu.memory_space<vmem>>, vector<1x24x8xf32>,
    %cst_86 = arith.constant 0.000000e+00 : f32
    %101 = vector.broadcast %cst_86 : f32 to vector<24x8xf32>
    %c9_87 = arith.constant 9 : index
    %c0_88 = arith.constant 0 : index
    %c0_89 = arith.constant 0 : index
    %102 = vector.load %arg10[%c9_87, %c0_88, %c0_89] : memref<10x24x8xf32, #tpu.memory_space<vmem>>, vector<1x24x8xf32>
    %103 = vector.shape_cast %102 : vector<1x24x8xf32> to vector<24x8xf32>
    %104 = vector.shape_cast %101 : vector<24x8xf32> to vector<1x24x8xf32>
    tpu.vector_store %arg10[%c9_87, %c0_88, %c0_89], %104 {strides = array<i32>} : memref<10x24x8xf32, #tpu.memory_space<vmem>>, vector<1x24x8xf32>,
    %cst_90 = arith.constant 0.000000e+00 : f32
    %105 = vector.broadcast %cst_90 : f32 to vector<8x8x8xf32>
    %c1_91 = arith.constant 1 : index
    %c0_92 = arith.constant 0 : index
    %c0_93 = arith.constant 0 : index
    %106 = vector.load %arg10[%c1_91, %c0_92, %c0_93] : memref<10x24x8xf32, #tpu.memory_space<vmem>>, vector<8x8x8xf32>
    tpu.vector_store %arg10[%c1_91, %c0_92, %c0_93], %105 {strides = array<i32>} : memref<10x24x8xf32, #tpu.memory_space<vmem>>, vector<8x8x8xf32>,
    %cst_94 = arith.constant 0.000000e+00 : f32
    %107 = vector.broadcast %cst_94 : f32 to vector<8x8x8xf32>
    %c1_95 = arith.constant 1 : index
    %c16_96 = arith.constant 16 : index
    %c0_97 = arith.constant 0 : index
    %108 = vector.load %arg10[%c1_95, %c16_96, %c0_97] : memref<10x24x8xf32, #tpu.memory_space<vmem>>, vector<8x8x8xf32>
    tpu.vector_store %arg10[%c1_95, %c16_96, %c0_97], %107 {strides = array<i32>} : memref<10x24x8xf32, #tpu.memory_space<vmem>>, vector<8x8x8xf32>,
    %c1_98 = arith.constant 1 : index
    %c8_99 = arith.constant 8 : index
    %c0_100 = arith.constant 0 : index
    %109 = vector.load %arg10[%c1_98, %c8_99, %c0_100] : memref<10x24x8xf32, #tpu.memory_space<vmem>>, vector<8x8x8xf32>
    tpu.vector_store %arg10[%c1_98, %c8_99, %c0_100], %96 {strides = array<i32>} : memref<10x24x8xf32, #tpu.memory_space<vmem>>, vector<8x8x8xf32>,
    %cst_101 = arith.constant 0.000000e+00 : f32
    %110 = vector.broadcast %cst_101 : f32 to vector<64x8xf32>
    %c0_102 = arith.constant 0 : index
    %c0_103 = arith.constant 0 : index
    %c0_104 = arith.constant 0 : index
    %111 = vector.load %arg10[%c0_102, %c0_103, %c0_104] : memref<10x24x8xf32, #tpu.memory_space<vmem>>, vector<8x24x8xf32>
    %112 = vector.extract_strided_slice %111 {offsets = [0, 7, 0], sizes = [8, 8, 8], strides = [1, 1, 1]} : vector<8x24x8xf32> to vector<8x8x8xf32>
    %113 = vector.shape_cast %112 : vector<8x8x8xf32> to vector<64x8xf32>
    %114 = arith.truncf %113 : vector<64x8xf32> to vector<64x8xbf16>
    %c0_105 = arith.constant 0 : index
    %c0_106 = arith.constant 0 : index
    %c0_107 = arith.constant 0 : index
    %c0_108 = arith.constant 0 : index
    %115 = vector.load %arg5[%c0_105, %c0_106, %c0_107, %c0_108] : memref<3x3x8x8xbf16, #tpu.memory_space<vmem>>, vector<1x1x8x8xbf16>
    %116 = vector.shape_cast %115 : vector<1x1x8x8xbf16> to vector<8x8xbf16>
    %cst_109 = arith.constant dense<0.000000e+00> : vector<64x8xf32>
    %117 = tpu.matmul %114, %116, %cst_109 {dimension_numbers = #tpu.dot_dimension_numbers<[1], [0], [0], [1], [0, 0, 1, 1], [], []>} : vector<64x8xbf16>, vector<8x8xbf16>, vector<64x8xf32> -> vector<64x8xf32>
    %118 = arith.addf %110, %117 : vector<64x8xf32>
    %119 = vector.extract_strided_slice %111 {offsets = [0, 8, 0], sizes = [8, 8, 8], strides = [1, 1, 1]} : vector<8x24x8xf32> to vector<8x8x8xf32>
    %120 = vector.shape_cast %119 : vector<8x8x8xf32> to vector<64x8xf32>
    %121 = arith.truncf %120 : vector<64x8xf32> to vector<64x8xbf16>
    %c0_110 = arith.constant 0 : index
    %c1_111 = arith.constant 1 : index
    %c0_112 = arith.constant 0 : index
    %c0_113 = arith.constant 0 : index
    %122 = vector.load %arg5[%c0_110, %c1_111, %c0_112, %c0_113] : memref<3x3x8x8xbf16, #tpu.memory_space<vmem>>, vector<1x1x8x8xbf16>
    %123 = vector.shape_cast %122 : vector<1x1x8x8xbf16> to vector<8x8xbf16>
    %cst_114 = arith.constant dense<0.000000e+00> : vector<64x8xf32>
    %124 = tpu.matmul %121, %123, %cst_114 {dimension_numbers = #tpu.dot_dimension_numbers<[1], [0], [0], [1], [0, 0, 1, 1], [], []>} : vector<64x8xbf16>, vector<8x8xbf16>, vector<64x8xf32> -> vector<64x8xf32>
    %125 = arith.addf %118, %124 : vector<64x8xf32>
    %126 = vector.extract_strided_slice %111 {offsets = [0, 9, 0], sizes = [8, 8, 8], strides = [1, 1, 1]} : vector<8x24x8xf32> to vector<8x8x8xf32>
    %127 = vector.shape_cast %126 : vector<8x8x8xf32> to vector<64x8xf32>
    %128 = arith.truncf %127 : vector<64x8xf32> to vector<64x8xbf16>
    %c0_115 = arith.constant 0 : index
    %c2_116 = arith.constant 2 : index
    %c0_117 = arith.constant 0 : index
    %c0_118 = arith.constant 0 : index
    %129 = vector.load %arg5[%c0_115, %c2_116, %c0_117, %c0_118] : memref<3x3x8x8xbf16, #tpu.memory_space<vmem>>, vector<1x1x8x8xbf16>
    %130 = vector.shape_cast %129 : vector<1x1x8x8xbf16> to vector<8x8xbf16>
    %cst_119 = arith.constant dense<0.000000e+00> : vector<64x8xf32>
    %131 = tpu.matmul %128, %130, %cst_119 {dimension_numbers = #tpu.dot_dimension_numbers<[1], [0], [0], [1], [0, 0, 1, 1], [], []>} : vector<64x8xbf16>, vector<8x8xbf16>, vector<64x8xf32> -> vector<64x8xf32>
    %132 = arith.addf %125, %131 : vector<64x8xf32>
    %c1_120 = arith.constant 1 : index
    %c0_121 = arith.constant 0 : index
    %c0_122 = arith.constant 0 : index
    %133 = vector.load %arg10[%c1_120, %c0_121, %c0_122] : memref<10x24x8xf32, #tpu.memory_space<vmem>>, vector<8x24x8xf32>
    %134 = vector.extract_strided_slice %133 {offsets = [0, 7, 0], sizes = [8, 8, 8], strides = [1, 1, 1]} : vector<8x24x8xf32> to vector<8x8x8xf32>
    %135 = vector.shape_cast %134 : vector<8x8x8xf32> to vector<64x8xf32>
    %136 = arith.truncf %135 : vector<64x8xf32> to vector<64x8xbf16>
    %c1_123 = arith.constant 1 : index
    %c0_124 = arith.constant 0 : index
    %c0_125 = arith.constant 0 : index
    %c0_126 = arith.constant 0 : index
    %137 = vector.load %arg5[%c1_123, %c0_124, %c0_125, %c0_126] : memref<3x3x8x8xbf16, #tpu.memory_space<vmem>>, vector<1x1x8x8xbf16>
    %138 = vector.shape_cast %137 : vector<1x1x8x8xbf16> to vector<8x8xbf16>
    %cst_127 = arith.constant dense<0.000000e+00> : vector<64x8xf32>
    %139 = tpu.matmul %136, %138, %cst_127 {dimension_numbers = #tpu.dot_dimension_numbers<[1], [0], [0], [1], [0, 0, 1, 1], [], []>} : vector<64x8xbf16>, vector<8x8xbf16>, vector<64x8xf32> -> vector<64x8xf32>
    %140 = arith.addf %132, %139 : vector<64x8xf32>
    %141 = vector.extract_strided_slice %133 {offsets = [0, 8, 0], sizes = [8, 8, 8], strides = [1, 1, 1]} : vector<8x24x8xf32> to vector<8x8x8xf32>
    %142 = vector.shape_cast %141 : vector<8x8x8xf32> to vector<64x8xf32>
    %143 = arith.truncf %142 : vector<64x8xf32> to vector<64x8xbf16>
    %c1_128 = arith.constant 1 : index
    %c1_129 = arith.constant 1 : index
    %c0_130 = arith.constant 0 : index
    %c0_131 = arith.constant 0 : index
    %144 = vector.load %arg5[%c1_128, %c1_129, %c0_130, %c0_131] : memref<3x3x8x8xbf16, #tpu.memory_space<vmem>>, vector<1x1x8x8xbf16>
    %145 = vector.shape_cast %144 : vector<1x1x8x8xbf16> to vector<8x8xbf16>
    %cst_132 = arith.constant dense<0.000000e+00> : vector<64x8xf32>
    %146 = tpu.matmul %143, %145, %cst_132 {dimension_numbers = #tpu.dot_dimension_numbers<[1], [0], [0], [1], [0, 0, 1, 1], [], []>} : vector<64x8xbf16>, vector<8x8xbf16>, vector<64x8xf32> -> vector<64x8xf32>
    %147 = arith.addf %140, %146 : vector<64x8xf32>
    %148 = vector.extract_strided_slice %133 {offsets = [0, 9, 0], sizes = [8, 8, 8], strides = [1, 1, 1]} : vector<8x24x8xf32> to vector<8x8x8xf32>
    %149 = vector.shape_cast %148 : vector<8x8x8xf32> to vector<64x8xf32>
    %150 = arith.truncf %149 : vector<64x8xf32> to vector<64x8xbf16>
    %c1_133 = arith.constant 1 : index
    %c2_134 = arith.constant 2 : index
    %c0_135 = arith.constant 0 : index
    %c0_136 = arith.constant 0 : index
    %151 = vector.load %arg5[%c1_133, %c2_134, %c0_135, %c0_136] : memref<3x3x8x8xbf16, #tpu.memory_space<vmem>>, vector<1x1x8x8xbf16>
    %152 = vector.shape_cast %151 : vector<1x1x8x8xbf16> to vector<8x8xbf16>
    %cst_137 = arith.constant dense<0.000000e+00> : vector<64x8xf32>
    %153 = tpu.matmul %150, %152, %cst_137 {dimension_numbers = #tpu.dot_dimension_numbers<[1], [0], [0], [1], [0, 0, 1, 1], [], []>} : vector<64x8xbf16>, vector<8x8xbf16>, vector<64x8xf32> -> vector<64x8xf32>
    %154 = arith.addf %147, %153 : vector<64x8xf32>
    %c2_138 = arith.constant 2 : index
    %c0_139 = arith.constant 0 : index
    %c0_140 = arith.constant 0 : index
    %155 = vector.load %arg10[%c2_138, %c0_139, %c0_140] : memref<10x24x8xf32, #tpu.memory_space<vmem>>, vector<8x24x8xf32>
    %156 = vector.extract_strided_slice %155 {offsets = [0, 7, 0], sizes = [8, 8, 8], strides = [1, 1, 1]} : vector<8x24x8xf32> to vector<8x8x8xf32>
    %157 = vector.shape_cast %156 : vector<8x8x8xf32> to vector<64x8xf32>
    %158 = arith.truncf %157 : vector<64x8xf32> to vector<64x8xbf16>
    %c2_141 = arith.constant 2 : index
    %c0_142 = arith.constant 0 : index
    %c0_143 = arith.constant 0 : index
    %c0_144 = arith.constant 0 : index
    %159 = vector.load %arg5[%c2_141, %c0_142, %c0_143, %c0_144] : memref<3x3x8x8xbf16, #tpu.memory_space<vmem>>, vector<1x1x8x8xbf16>
    %160 = vector.shape_cast %159 : vector<1x1x8x8xbf16> to vector<8x8xbf16>
    %cst_145 = arith.constant dense<0.000000e+00> : vector<64x8xf32>
    %161 = tpu.matmul %158, %160, %cst_145 {dimension_numbers = #tpu.dot_dimension_numbers<[1], [0], [0], [1], [0, 0, 1, 1], [], []>} : vector<64x8xbf16>, vector<8x8xbf16>, vector<64x8xf32> -> vector<64x8xf32>
    %162 = arith.addf %154, %161 : vector<64x8xf32>
    %163 = vector.extract_strided_slice %155 {offsets = [0, 8, 0], sizes = [8, 8, 8], strides = [1, 1, 1]} : vector<8x24x8xf32> to vector<8x8x8xf32>
    %164 = vector.shape_cast %163 : vector<8x8x8xf32> to vector<64x8xf32>
    %165 = arith.truncf %164 : vector<64x8xf32> to vector<64x8xbf16>
    %c2_146 = arith.constant 2 : index
    %c1_147 = arith.constant 1 : index
    %c0_148 = arith.constant 0 : index
    %c0_149 = arith.constant 0 : index
    %166 = vector.load %arg5[%c2_146, %c1_147, %c0_148, %c0_149] : memref<3x3x8x8xbf16, #tpu.memory_space<vmem>>, vector<1x1x8x8xbf16>
    %167 = vector.shape_cast %166 : vector<1x1x8x8xbf16> to vector<8x8xbf16>
    %cst_150 = arith.constant dense<0.000000e+00> : vector<64x8xf32>
    %168 = tpu.matmul %165, %167, %cst_150 {dimension_numbers = #tpu.dot_dimension_numbers<[1], [0], [0], [1], [0, 0, 1, 1], [], []>} : vector<64x8xbf16>, vector<8x8xbf16>, vector<64x8xf32> -> vector<64x8xf32>
    %169 = arith.addf %162, %168 : vector<64x8xf32>
    %170 = vector.extract_strided_slice %155 {offsets = [0, 9, 0], sizes = [8, 8, 8], strides = [1, 1, 1]} : vector<8x24x8xf32> to vector<8x8x8xf32>
    %171 = vector.shape_cast %170 : vector<8x8x8xf32> to vector<64x8xf32>
    %172 = arith.truncf %171 : vector<64x8xf32> to vector<64x8xbf16>
    %c2_151 = arith.constant 2 : index
    %c2_152 = arith.constant 2 : index
    %c0_153 = arith.constant 0 : index
    %c0_154 = arith.constant 0 : index
    %173 = vector.load %arg5[%c2_151, %c2_152, %c0_153, %c0_154] : memref<3x3x8x8xbf16, #tpu.memory_space<vmem>>, vector<1x1x8x8xbf16>
    %174 = vector.shape_cast %173 : vector<1x1x8x8xbf16> to vector<8x8xbf16>
    %cst_155 = arith.constant dense<0.000000e+00> : vector<64x8xf32>
    %175 = tpu.matmul %172, %174, %cst_155 {dimension_numbers = #tpu.dot_dimension_numbers<[1], [0], [0], [1], [0, 0, 1, 1], [], []>} : vector<64x8xbf16>, vector<8x8xbf16>, vector<64x8xf32> -> vector<64x8xf32>
    %176 = arith.addf %169, %175 : vector<64x8xf32>
    %c0_156 = arith.constant 0 : index
    %c0_157 = arith.constant 0 : index
    %177 = vector.load %arg6[%c0_156, %c0_157] : memref<1x8xf32, #tpu.memory_space<vmem>>, vector<1x8xf32>
    %178 = vector.broadcast %177 : vector<1x8xf32> to vector<64x8xf32>
    %179 = arith.mulf %176, %178 : vector<64x8xf32>
    %c0_158 = arith.constant 0 : index
    %c0_159 = arith.constant 0 : index
    %180 = vector.load %arg7[%c0_158, %c0_159] : memref<1x8xf32, #tpu.memory_space<vmem>>, vector<1x8xf32>
    %181 = vector.broadcast %180 : vector<1x8xf32> to vector<64x8xf32>
    %182 = arith.addf %179, %181 : vector<64x8xf32>
    %cst_160 = arith.constant 0.000000e+00 : f32
    %183 = vector.broadcast %cst_160 : f32 to vector<64x8xf32>
    %184 = arith.maximumf %182, %183 : vector<64x8xf32>
    %185 = vector.shape_cast %184 : vector<64x8xf32> to vector<8x8x8xf32>
    %c0_161 = arith.constant 0 : index
    %c0_162 = arith.constant 0 : index
    %c0_163 = arith.constant 0 : index
    %c0_164 = arith.constant 0 : index
    %186 = vector.load %arg8[%c0_161, %c0_162, %c0_163, %c0_164] : memref<1x8x8x8xf32, #tpu.memory_space<vmem>>, vector<1x8x8x8xf32>
    %187 = vector.shape_cast %186 : vector<1x8x8x8xf32> to vector<8x8x8xf32>
    %188 = vector.shape_cast %185 : vector<8x8x8xf32> to vector<1x8x8x8xf32>
    tpu.vector_store %arg8[%c0_161, %c0_162, %c0_163, %c0_164], %188 {strides = array<i32>} : memref<1x8x8x8xf32, #tpu.memory_space<vmem>>, vector<1x8x8x8xf32>,
    return
  }
  func.func @transform_0(%arg0: i32) -> (i32, i32, i32, i32, i32) {
    %c0_i32 = arith.constant 0 : i32
    %c0_i32_0 = arith.constant 0 : i32
    %c0_i32_1 = arith.constant 0 : i32
    %c0_i32_2 = arith.constant 0 : i32
    %c0_i32_3 = arith.constant 0 : i32
    return %arg0, %c0_i32, %c0_i32_0, %c0_i32_1, %c0_i32_2 : i32, i32, i32, i32, i32
  }
  func.func @transform_1(%arg0: i32) -> (i32, i32, i32, i32) {
    %c0_i32 = arith.constant 0 : i32
    %c0_i32_0 = arith.constant 0 : i32
    %c0_i32_1 = arith.constant 0 : i32
    %c0_i32_2 = arith.constant 0 : i32
    %c0_i32_3 = arith.constant 0 : i32
    return %c0_i32, %c0_i32_0, %c0_i32_1, %c0_i32_2 : i32, i32, i32, i32
  }
  func.func @transform_2(%arg0: i32) -> (i32, i32) {
    %c0_i32 = arith.constant 0 : i32
    %c0_i32_0 = arith.constant 0 : i32
    %c0_i32_1 = arith.constant 0 : i32
    return %c0_i32, %c0_i32_0 : i32, i32
  }
  func.func @transform_3(%arg0: i32) -> (i32, i32) {
    %c0_i32 = arith.constant 0 : i32
    %c0_i32_0 = arith.constant 0 : i32
    %c0_i32_1 = arith.constant 0 : i32
    return %c0_i32, %c0_i32_0 : i32, i32
  }
  func.func @transform_4(%arg0: i32) -> (i32, i32, i32, i32) {
    %c0_i32 = arith.constant 0 : i32
    %c0_i32_0 = arith.constant 0 : i32
    %c0_i32_1 = arith.constant 0 : i32
    %c0_i32_2 = arith.constant 0 : i32
    %c0_i32_3 = arith.constant 0 : i32
    return %c0_i32, %c0_i32_0, %c0_i32_1, %c0_i32_2 : i32, i32, i32, i32
  }
  func.func @transform_5(%arg0: i32) -> (i32, i32) {
    %c0_i32 = arith.constant 0 : i32
    %c0_i32_0 = arith.constant 0 : i32
    %c0_i32_1 = arith.constant 0 : i32
    return %c0_i32, %c0_i32_0 : i32, i32
  }
  func.func @transform_6(%arg0: i32) -> (i32, i32) {
    %c0_i32 = arith.constant 0 : i32
    %c0_i32_0 = arith.constant 0 : i32
    %c0_i32_1 = arith.constant 0 : i32
    return %c0_i32, %c0_i32_0 : i32, i32
  }
  func.func @transform_7(%arg0: i32) -> (i32, i32, i32, i32) {
    %c0_i32 = arith.constant 0 : i32
    %c0_i32_0 = arith.constant 0 : i32
    %c0_i32_1 = arith.constant 0 : i32
    %c0_i32_2 = arith.constant 0 : i32
    return %arg0, %c0_i32, %c0_i32_0, %c0_i32_1 : i32, i32, i32, i32
  }
}

</mosaic_0001>

<bundles_post_ra>
// kernel: tpu_custom_call.1
= control target key start
LH: loop header
LB: loop body
LE: loop exit
PB: predicated region body
PF: predicated region fallthrough
CT: control target
= control target key end

     0   :  { %12 = vsyncpa [#allocation5], 0  ;;  %s4544_s0 = inlined_call_operand.hbm [shape: f32[2,8,2,8,8], index: 0, kind: input, shape index: {}]   ;;  %s4545_s1 = inlined_call_operand.hbm [shape: bf16[3,3,4,8], index: 1, kind: input, shape index: {}]   ;;  %s4546_s2 = inlined_call_operand.vmem [shape: f32[1,8], index: 2, kind: input, shape index: {}]   ;;  %s4547_s3 = inlined_call_operand.vmem [shape: f32[1,8], index: 3, kind: input, shape index: {}]   ;;  %s4548_s4 = inlined_call_operand.hbm [shape: bf16[3,3,8,8], index: 4, kind: input, shape index: {}]   ;;  %s4549_s5 = inlined_call_operand.vmem [shape: f32[1,8], index: 5, kind: input, shape index: {}]   ;;  %s4550_s6 = inlined_call_operand.vmem [shape: f32[1,8], index: 6, kind: input, shape index: {}]   ;;  %s4551_s7 = inlined_call_operand.hbm [shape: f32[2,8,8,8], index: 7, kind: output, shape index: {}]  }
   0x1   :  { %14 = vsyncpa [#allocation5 + $0x1], 0 }
   0x2   :  { %15 = vsyncpa [#allocation8], 0 }
   0x3   :  { %16 = vsyncpa [#allocation6], 0 }
   0x4   :  { %18 = vsyncpa [#allocation6 + $0x1], 0  ;;  %s3793_s24 = smov 0   ;;  %s3795_s25 = smov 0  }
   0x5   :  { %s3797_s26 = smov 0   ;;  %s3799_s27 = smov 0  }
   0x6 LB: > { %s3814_s28 = sadd.s32 4294967295, %s3737_s27   ;;  %s2984_s29 = sadd.s32 4294967294, %s3737_s27   ;;  %s3737_s27 = sphi %s3799_s27, %s4571_s27   ;;  %s3733_s26 = sphi %s3797_s26, %s4570_s26   ;;  %s3729_s25 = sphi %s3795_s25, %s4569_s25   ;;  %s3725_s24 = sphi %s3793_s24, %s4568_s24  }
   0x7   : > { %p44_p0 = scmp.ne.s32.totalorder %s3729_s25, %s3725_s24  ;;  %p4552_p1 = scmp.eq.s32.totalorder %s3814_s28, 0 }
   0x8   : > { %p200_p3 = scmp.eq.s32.totalorder %s2984_s29, 1  ;;  %p2985_p5 = scmp.ge.s32.totalorder %s3737_s27, 1 }
   0x9   : > { %p3823_p4 = por %p4552_p1, %p44_p0  ;;  %p207_p7 = scmp.lt.s32.totalorder %s3737_s27, 3 }
   0xa   : > { %p3828_p6 = por %p200_p3, %p44_p0  ;;  %s3739_s10 = smov [#allocation7]  }
   0xb   : > { %s4555_s30 = scalar_select %p3823_p4, 1, 0 }
   0xc   : > { %s4556_s8 = scalar_select %p3828_p6, 1, 0 }
   0xd   : > { %p3833_p8 = pnand %p2985_p5, %p207_p7  ;;  %s219_s11 = sshll.u32 %s3739_s10, 4  ;;  %s3837_s11 = int_to_ptr.vmem [resolvable:$true] %s219_s11 }
   0xe   : > { %s3740_s13 = smov [#allocation9]   ;;  %s3581_s17 = scalar_lea.hbm %s4545_s1, 288 }
   0xf   : > { %p3516_p9 = pneg %p3833_p8  ;;  %s238_s14 = sshll.u32 %s3740_s13, 4  ;;  %s3848_s14 = int_to_ptr.vmem [resolvable:$true] %s238_s14 }
  0x10   : > { %p3582_p12 = scmp.ne.s32.totalorder %s4545_s1, %s3581_s17  ;;  %p3588_p5 = scmp.lt.u32.totalorder %s3581_s17, %s4545_s1 }
  0x11   : > { %p3844_p11 = pnand %p3516_p9, %p4552_p1 }
  0x13   : > { %p3583_p13 = pneg %p3844_p11 }
  0x15   : > { %p3584_p0 = pnand %p3583_p13, %p3582_p12 }
  0x17   : > { %p3585_p3 = pneg %p3584_p0 }
  0x19   : > { %p3590_p7 = pnand %p3588_p5, %p3585_p3 }
  0x1b   : > { %3593 = shalt.err (!%p3590_p7)
}
  0x1c   : > { %s3594_s22 = scalar_lea.vmem %s3837_s11, 288  ;;  %p3602_p2 = scmp.lt.s32.totalorder %s3837_s11, %s3837_s11 }
  0x1d   : > { %p3595_p9 = scmp.ne.s32.totalorder %s3837_s11, %s3594_s22  ;;  %p3603_p12 = scmp.lt.s32.totalorder %s3594_s22, %s3594_s22 }
  0x1f   : > { %p3597_p10 = pnand %p3595_p9, %p3583_p13  ;;  %p3604_p0 = por %p3603_p12, %p3602_p2 }
  0x21   : > { %p3598_p1 = pneg %p3597_p10 }
  0x23   : > { %p3605_p6 = pnand %p3604_p0, %p3598_p1 }
  0x25   : > { %3608 = shalt.err (!%p3605_p6)
}
  0x26   : > { %s3741_s23 = smov 32   ;;  %s3742_s29 = smov 2  }
  0x27   : > { %3519 = dma.hbm_to_vmem [thread:$0]  (!%p3844_p11), %s4545_s1, 288, %s3837_s11, [#allocation8], %s3741_s23, %s3741_s23, %s3742_s29  }
  0x28   : > { %s3609_s17 = scalar_lea.hbm %s4548_s4, 576 }
  0x29   : > { %p3610_p2 = scmp.ne.s32.totalorder %s4548_s4, %s3609_s17  ;;  %p3616_p10 = scmp.lt.u32.totalorder %s3609_s17, %s4548_s4 }
  0x2b   : > { %p3612_p1 = pnand %p3610_p2, %p3583_p13 }
  0x2d   : > { %p3613_p6 = pneg %p3612_p1 }
  0x2f   : > { %p3618_p3 = pnand %p3616_p10, %p3613_p6 }
  0x31   : > { %3621 = shalt.err (!%p3618_p3)
}
  0x32   : > { %s3622_s11 = scalar_lea.vmem %s3848_s14, 576  ;;  %p3630_p12 = scmp.lt.s32.totalorder %s3848_s14, %s3848_s14 }
  0x33   : > { %p3623_p5 = scmp.ne.s32.totalorder %s3848_s14, %s3622_s11  ;;  %p3631_p0 = scmp.lt.s32.totalorder %s3622_s11, %s3622_s11 }
  0x35   : > { %p3625_p7 = pnand %p3623_p5, %p3583_p13  ;;  %p3632_p2 = por %p3631_p0, %p3630_p12 }
  0x37   : > { %p3626_p9 = pneg %p3625_p7 }
  0x39   : > { %p3633_p1 = pnand %p3632_p2, %p3626_p9 }
  0x3b   : > { %3636 = shalt.err (!%p3633_p1)
}
  0x3c   : > { %s3743_s22 = smov 64   ;;  %s3744_s23 = smov 4  }
  0x3d   : > { %3522 = dma.hbm_to_vmem [thread:$0]  (!%p3844_p11), %s4548_s4, 576, %s3848_s14, [#allocation8], %s3743_s22, %s3743_s22, %s3744_s23  }
  0x3e   : > { %s3903_s13 = sadd.s32 1, %s3737_s27   ;;  %s31_s16 = sadd.s32 1, %s3733_s26 }
  0x3f   : > { %s28_s15 = ssub.s32 %s3737_s27, %s3903_s13  ;;  %p38_p6 = scmp.ne.s32.totalorder %s3733_s26, %s3729_s25 }
  0x40   : > { %p29_p13 = scmp.eq.s32.totalorder %s28_s15, 0  ;;  %p39_p10 = scmp.eq.s32.totalorder %s3737_s27, 0 }
  0x41   : > { %p4559_p5 = scmp.eq.s32.totalorder %s3814_s28, 1  ;;  %p3533_p9 = scmp.lt.s32.totalorder %s3737_s27, 2 }
  0x42   : > { %s3912_s17 = scalar_select %p29_p13, %s3733_s26, %s31_s16  }
  0x43   : > { %p40_p3 = por %p39_p10, %p38_p6  ;;  %p3916_p7 = por %p4559_p5, %p38_p6 }
  0x44   : > { %s258_s12 = sand.u32 1, %s3733_s26   ;;  %s3086_s14 = sshll.u32 %s3737_s27, 11 }
  0x45   : > { %s4560_s18 = scalar_select %p3916_p7, 1, 0 }
  0x46   : > { %s2989_s19 = sshll.u32 %s258_s12, 7  ;;  %s3926_s11 = scalar_lea.hbm %s4544_s0, %s3086_s14 }
  0x47   : > { %s262_s22 = scalar_lea.vmem [#allocation4], %s2989_s19  ;;  %p3930_p11 = pnand %p3533_p9, %p40_p3 }
  0x48   : > { %s269_s23 = sshll.u32 %s262_s22, 4  ;;  %s3934_s10 = scalar_lea.sflag [#allocation5], %s258_s12  ;;  %s3928_s23 = int_to_ptr.vmem [resolvable:$true] %s269_s23 }
  0x49   : > { %s3637_s15 = scalar_lea.hbm %s3926_s11, 2048  ;;  %p3639_p0 = pneg %p3930_p11 }
  0x4a   : > { %p3638_p12 = scmp.ne.s32.totalorder %s3926_s11, %s3637_s15  ;;  %s3642_s14 = scalar_lea.hbm %s4544_s0, 4096 }
  0x4b   : > { %p3643_p13 = scmp.lt.u32.totalorder %s3926_s11, %s4544_s0  ;;  %p3644_p6 = scmp.lt.u32.totalorder %s3642_s14, %s3637_s15 }
  0x4c   : > { %p3640_p2 = pnand %p3639_p0, %p3638_p12  ;;  %p3646_p3 = scmp.lt.u32.totalorder %s3637_s15, %s3926_s11 }
  0x4d   : > { %p3645_p10 = por %p3644_p6, %p3643_p13 }
  0x4e   : > { %p3641_p1 = pneg %p3640_p2 }
  0x4f   : > { %p3647_p5 = por %p3646_p3, %p3645_p10 }
  0x51   : > { %p3648_p9 = pnand %p3647_p5, %p3641_p1 }
  0x53   : > { %3651 = shalt.err (!%p3648_p9)
}
  0x54   : > { %s3652_s12 = scalar_lea.vmem %s3928_s23, 2048  ;;  %s3745_s22 = smov [#allocation4]  }
  0x55   : > { %p3653_p12 = scmp.ne.s32.totalorder %s3928_s23, %s3652_s12  ;;  %s3657_s16 = sshll.u32 %s3745_s22, 4  ;;  %s3658_s16 = int_to_ptr.vmem [resolvable:$false] %s3657_s16 }
  0x56   : > { %s3659_s19 = scalar_lea.vmem %s3658_s16, 4096  ;;  %p3660_p4 = scmp.lt.s32.totalorder %s3928_s23, %s3658_s16 }
  0x57   : > { %p3655_p2 = pnand %p3653_p12, %p3639_p0  ;;  %p3661_p13 = scmp.lt.s32.totalorder %s3659_s19, %s3652_s12 }
  0x59   : > { %p3656_p7 = pneg %p3655_p2  ;;  %p3662_p6 = por %p3661_p13, %p3660_p4 }
  0x5b   : > { %p3663_p10 = pnand %p3662_p6, %p3656_p7 }
  0x5d   : > { %3666 = shalt.err (!%p3663_p10)
}
  0x5e   : > { %s3746_s15 = smov 128   ;;  %s3747_s14 = smov 8  }
  0x5f   : > { %3526 = dma.hbm_to_vmem [thread:$0]  (!%p3930_p11), %s3926_s11, 2048, %s3928_s23, %s3934_s10, %s3746_s15, %s3746_s15, %s3747_s14  }
  0x60   : > { %281 = sbr.rel (%p3833_p8) target bundleno = 973 (0x3cd), region = 48  ;;  %s3965_s20 = sand.u32 (!%p3833_p8), 1, %s3729_s25  }
  0x61   : > { %s2993_s21 = sshll.u32 (!%p3833_p8), %s3965_s20, 7  ;;  %s284_s12 = scalar_lea.sflag (!%p3833_p8), [#allocation5], %s3965_s20 }
  0x62   : > { %s3969_s22 = scalar_lea.vmem (!%p3833_p8), [#allocation4], %s2993_s21  ;;  %p4562_p4 = scmp.ne.s32.totalorder (!%p3833_p8), %s4555_s30, 0 }
  0x67   : > { %3712 = dma.done.wait (%p4562_p4), %s284_s12, 2048  }
  0x68   : > { %3714 = vsyncadd (%p4562_p4), %s284_s12, 4294965248  ;;  %p4563_p7 = scmp.eq.s32.totalorder %s3814_s28, 0 }
  0x6a   : > { %3716 = dma.done.wait (%p4563_p7), [#allocation8], 864   ;;  %p4564_p8 = pmov %p4563_p7 }
  0x6b   : > { %vm392_vm0 = vcmask 31744   ;;  %v3748_v0 = vmov 0.0   ;;  %v329_v1 = vld [vmem:[%s3969_s22 + $0x20] sm:$0xff]  ;;  %v2999_v2 = vld [vmem:[%s3969_s22 + $0x28] sm:$0xff]  ;;  %v330_v6 = vld [vmem:[%s3969_s22 + $0x30] sm:$0xff]  ;;  %s3749_s30 = smov 124  }
  0x6c   : > { %3718 = vsyncadd (%p4564_p8), [#allocation8], 4294966432  ;;  %394 = vst.msk [vmem:[#allocation2 + $0x8] sm:$0xff] %vm392_vm0, %v3748_v0  ;;  %v327_v3 = vld [vmem:[%s3969_s22] sm:$0xff]  ;;  %v346_v4 = vmax.f32 %v329_v1, %v2999_v2  ;;  %v2997_v5 = vld [vmem:[%s3969_s22 + $0x8] sm:$0xff]  ;;  %vm521_vm1 = vcmask 1041408  }
  0x6d   : > { %393 = vst.msk [vmem:[#allocation2] sm:$0xff] %vm392_vm0, %v3748_v0  ;;  %395 = vst.msk [vmem:[#allocation2 + $0x10] sm:$0xff] %vm392_vm0, %v3748_v0  ;;  %v3000_v7 = vld [vmem:[%s3969_s22 + $0x38] sm:$0xff]  ;;  %v344_v8 = vmax.f32 %v327_v3, %v2997_v5  ;;  %v328_v9 = vld [vmem:[%s3969_s22 + $0x10] sm:$0xff]  ;;  %vm465_vm2 = vcmask 1040384   ;;  %vm678_vm3 = vcmask 1046528  }
  0x6e   : > { %397 = vst.msk [vmem:[#allocation2 + $0xd8] sm:$0xff] %vm392_vm0, %v3748_v0  ;;  %398 = vst.msk [vmem:[#allocation2 + $0xe0] sm:$0xff] %vm392_vm0, %v3748_v0  ;;  %v2998_v10 = vld [vmem:[%s3969_s22 + $0x18] sm:$0xff]  ;;  %364 = vrot.lane.b32.xlu1 %v346_v4, %s3749_s30  ;;  %v347_v11 = vmax.f32 %v330_v6, %v3000_v7  ;;  %v332_v13 = vld [vmem:[%s3969_s22 + $0x50] sm:$0xff]  ;;  %vm1632_vm4 = vcmask 64512   ;;  %vm1760_vm5 = vcmask 1043456  }
  0x6f   : > { %399 = vst.msk [vmem:[#allocation2 + $0xe8] sm:$0xff] %vm392_vm0, %v3748_v0  ;;  %401 = vst.msk [vmem:[#allocation2 + $0x18] sm:$0xff] %vm392_vm0, %v3748_v0  ;;  %360 = vrot.lane.b32.xlu0 %v344_v8, %s3749_s30  ;;  %v345_v12 = vmax.f32 %v328_v9, %v2998_v10  ;;  %v3002_v14 = vld [vmem:[%s3969_s22 + $0x58] sm:$0xff]  ;;  %v331_v15 = vld [vmem:[%s3969_s22 + $0x40] sm:$0xff]  ;;  %s2996_s14 = sshll.u32 %s3965_s20, 6  ;;  %s3087_s12 = sshll.u32 %s3814_s28, 10 }
  0x70   : > { %402 = vst.msk [vmem:[#allocation2 + $0x30] sm:$0xff] %vm392_vm0, %v3748_v0  ;;  %403 = vst.msk [vmem:[#allocation2 + $0x48] sm:$0xff] %vm392_vm0, %v3748_v0  ;;  %v3001_v16 = vld [vmem:[%s3969_s22 + $0x48] sm:$0xff]  ;;  %v508_v17 = vld [vmem:[#allocation7 + $0x2] sm:$0x3]  ;;  %v349_v20 = vmax.f32 %v332_v13, %v3002_v14  ;;  %s325_s21 = scalar_lea.vmem [#allocation10], %s2996_s14  ;;  %s4495_s11 = scalar_lea.hbm %s4551_s7, %s3087_s12 }
  0x71   : > { %404 = vst.msk [vmem:[#allocation2 + $0x60] sm:$0xff] %vm392_vm0, %v3748_v0  ;;  %405 = vst.msk [vmem:[#allocation2 + $0x78] sm:$0xff] %vm392_vm0, %v3748_v0  ;;  %3486 = vmatprep.subr.msk.bf16.mxu0 %vm521_vm1, %v508_v17  ;;  %v523_v18 = vsel %vm521_vm1, %v508_v17, 0  ;;  %v502_v19 = vld [vmem:[#allocation7] sm:$0x3]  ;;  %v348_v21 = vmax.f32 %v331_v15, %v3001_v16  ;;  %v334_v22 = vld [vmem:[%s3969_s22 + $0x70] sm:$0xff] }
  0x72   : > { %406 = vst.msk [vmem:[#allocation2 + $0x90] sm:$0xff] %vm392_vm0, %v3748_v0  ;;  %407 = vst.msk [vmem:[#allocation2 + $0xa8] sm:$0xff] %vm392_vm0, %v3748_v0  ;;  %366 = vrot.lane.b32.xlu1 %v347_v11, %s3749_s30  ;;  %3179 = vmatpush3.bf16.msra.mxu0 %v523_v18  ;;  %v3004_v23 = vld [vmem:[%s3969_s22 + $0x78] sm:$0xff]  ;;  %v333_v24 = vld [vmem:[%s3969_s22 + $0x60] sm:$0xff]  ;;  %v603_v52 = vsel %vm521_vm1, %v502_v19, 0  ;;  %s2879_s28 = scalar_lea.sflag [#allocation6], %s3965_s20 }
  0x73   : > { %408 = vst.msk [vmem:[#allocation2 + $0xc0] sm:$0xff] %vm392_vm0, %v3748_v0  ;;  %409 = vst.msk [vmem:[#allocation2 + $0x28] sm:$0xff] %vm392_vm0, %v3748_v0  ;;  %362 = vrot.lane.b32.xlu0 %v345_v12, %s3749_s30  ;;  %3487 = vmatprep.subr.msk.bf16.mxu0 %vm521_vm1, %v502_v19  ;;  %v3003_v25 = vld [vmem:[%s3969_s22 + $0x68] sm:$0xff]  ;;  %v351_v26 = vmax.f32 %v334_v22, %v3004_v23  ;;  %v716_v53 = vld [vmem:[#allocation7 + $0x4] sm:$0x3]  ;;  %s2892_s22 = sshll.u32 %s325_s21, 4  ;;  %s4497_s22 = int_to_ptr.vmem [resolvable:$true] %s2892_s22 }
  0x74   : > { %410 = vst.msk [vmem:[#allocation2 + $0x40] sm:$0xff] %vm392_vm0, %v3748_v0  ;;  %411 = vst.msk [vmem:[#allocation2 + $0x58] sm:$0xff] %vm392_vm0, %v3748_v0  ;;  %v350_v27 = vmax.f32 %v333_v24, %v3003_v25  ;;  %v4046_v39 = vld [vmem:[#allocation2 + $0x8] sm:$0xff]  ;;  %v425_v49 = vld [vmem:[#allocation2] sm:$0xff]  ;;  %v730_v23 = vsel %vm521_vm1, %v716_v53, 0  ;;  %s3667_s23 = scalar_lea.vmem %s4497_s22, 1024 }
  0x75   : > { %412 = vst.msk [vmem:[#allocation2 + $0x70] sm:$0xff] %vm392_vm0, %v3748_v0  ;;  %413 = vst.msk [vmem:[#allocation2 + $0x88] sm:$0xff] %vm392_vm0, %v3748_v0  ;;  %v467_v54 = vrot.slane %v4046_v39, 7  ;;  %v466_v56 = vrot.slane %v425_v49, 7  ;;  %p3668_p11 = scmp.ne.s32.totalorder %s4497_s22, %s3667_s23  ;;  %p4565_p0 = scmp.ne.s32.totalorder %s4560_s18, 0 }
  0x76   : > { %414 = vst.msk [vmem:[#allocation2 + $0xa0] sm:$0xff] %vm392_vm0, %v3748_v0  ;;  %415 = vst.msk [vmem:[#allocation2 + $0xb8] sm:$0xff] %vm392_vm0, %v3748_v0  ;;  %370 = vrot.lane.b32.xlu1 %v349_v20, %s3749_s30  ;;  %v428_v50 = vld [vmem:[#allocation2 + $0x18] sm:$0xff]  ;;  %s3750_s29 = smov [#allocation10]  }
  0x77   : > { %416 = vst.msk [vmem:[#allocation2 + $0xd0] sm:$0xff] %vm392_vm0, %v3748_v0  ;;  %368 = vrot.lane.b32.xlu0 %v348_v21, %s3749_s30  ;;  %v469_v57 = vrot.slane %v428_v50, 7  ;;  %v431_v61 = vld [vmem:[#allocation2 + $0x30] sm:$0xff]  ;;  %v434_v62 = vld [vmem:[#allocation2 + $0x48] sm:$0xff]  ;;  %v468_v63 = vsel %vm465_vm2, %v466_v56, %v467_v54  ;;  %p3669_p1 = pnand %p3668_p11, %p4565_p0  ;;  %s3671_s10 = sshll.u32 %s3750_s29, 4  ;;  %s3672_s10 = int_to_ptr.vmem [resolvable:$false] %s3671_s10 }
  0x78   : > { %v472_v5 = vrot.slane %v431_v61, 7  ;;  %1633 = vst.msk [vmem:[#allocation3] sm:$0xff] %vm1632_vm4, %v3748_v0  ;;  %1634 = vst.msk [vmem:[#allocation3 + $0x8] sm:$0xff] %vm1632_vm4, %v3748_v0  ;;  %s3673_s16 = scalar_lea.vmem %s3672_s10, 2048  ;;  %p3674_p5 = scmp.lt.s32.totalorder %s4497_s22, %s3672_s10 }
  0x79   : > { %v446_v19 = vld [vmem:[#allocation2 + $0xa8] sm:$0xff]  ;;  %v443_v25 = vld [vmem:[#allocation2 + $0x90] sm:$0xff]  ;;  %1635 = vst.msk [vmem:[#allocation3 + $0x10] sm:$0xff] %vm1632_vm4, %v3748_v0  ;;  %1637 = vst.msk [vmem:[#allocation3 + $0xd8] sm:$0xff] %vm1632_vm4, %v3748_v0  ;;  %p3670_p3 = pneg %p3669_p1  ;;  %p3675_p9 = scmp.lt.s32.totalorder %s3673_s16, %s3667_s23 }
  0x7a   : > { %374 = vrot.lane.b32.xlu1 %v351_v26, %s3749_s30  ;;  %1638 = vst.msk [vmem:[#allocation3 + $0xe0] sm:$0xff] %vm1632_vm4, %v3748_v0  ;;  %1639 = vst.msk [vmem:[#allocation3 + $0xe8] sm:$0xff] %vm1632_vm4, %v3748_v0 }
  0x7b   : > { %372 = vrot.lane.b32.xlu0 %v350_v27, %s3749_s30  ;;  %1641 = vst.msk [vmem:[#allocation3 + $0x18] sm:$0xff] %vm1632_vm4, %v3748_v0  ;;  %1642 = vst.msk [vmem:[#allocation3 + $0x30] sm:$0xff] %vm1632_vm4, %v3748_v0  ;;  %p3676_p12 = por %p3675_p9, %p3674_p5 }
  0x7c   : > { %1643 = vst.msk [vmem:[#allocation3 + $0x48] sm:$0xff] %vm1632_vm4, %v3748_v0  ;;  %1644 = vst.msk [vmem:[#allocation3 + $0x60] sm:$0xff] %vm1632_vm4, %v3748_v0 }
  0x7d   : > { %1645 = vst.msk [vmem:[#allocation3 + $0x78] sm:$0xff] %vm1632_vm4, %v3748_v0  ;;  %1646 = vst.msk [vmem:[#allocation3 + $0x90] sm:$0xff] %vm1632_vm4, %v3748_v0  ;;  %p3677_p2 = pnand %p3676_p12, %p3670_p3 }
  0x7e   : > { %1647 = vst.msk [vmem:[#allocation3 + $0xa8] sm:$0xff] %vm1632_vm4, %v3748_v0  ;;  %1648 = vst.msk [vmem:[#allocation3 + $0xc0] sm:$0xff] %vm1632_vm4, %v3748_v0 }
  0x7f   : > { %1649 = vst.msk [vmem:[#allocation3 + $0x28] sm:$0xff] %vm1632_vm4, %v3748_v0  ;;  %1650 = vst.msk [vmem:[#allocation3 + $0x40] sm:$0xff] %vm1632_vm4, %v3748_v0 }
  0x80   : > { %1651 = vst.msk [vmem:[#allocation3 + $0x58] sm:$0xff] %vm1632_vm4, %v3748_v0  ;;  %1652 = vst.msk [vmem:[#allocation3 + $0x70] sm:$0xff] %vm1632_vm4, %v3748_v0 }
  0x81   : > { %1653 = vst.msk [vmem:[#allocation3 + $0x88] sm:$0xff] %vm1632_vm4, %v3748_v0  ;;  %1654 = vst.msk [vmem:[#allocation3 + $0xa0] sm:$0xff] %vm1632_vm4, %v3748_v0 }
  0x82   : > { %1655 = vst.msk [vmem:[#allocation3 + $0xb8] sm:$0xff] %vm1632_vm4, %v3748_v0  ;;  %1656 = vst.msk [vmem:[#allocation3 + $0xd0] sm:$0xff] %vm1632_vm4, %v3748_v0 }
  0xe0   : > { %v365_v28 = vpop.permute.xlu1 %364 }
  0xe1   : > { %v386_v29 = vmax.f32 %v346_v4, %v365_v28  ;;  %v361_v30 = vpop.permute.xlu0 %360  ;;  %v440_v4 = vld [vmem:[#allocation2 + $0x78] sm:$0xff]  ;;  %v487_v28 = vrot.slane %v446_v19, 7 }
  0xe2   : > { %v384_v31 = vmax.f32 %v344_v8, %v361_v30  ;;  %v475_v8 = vrot.slane %v434_v62, 7  ;;  %v481_v13 = vrot.slane %v440_v4, 7  ;;  %v679_v30 = vrot.slane %v4046_v39, 1  ;;  %v448_v4 = vld [vmem:[#allocation2 + $0xb8] sm:$0xff] }
  0xe3   : > { %419 = vst.msk [vmem:[#allocation2 + $0x50] sm:$0xff] %vm392_vm0, %v386_v29  ;;  %v882_v29 = vld [vmem:[#allocation7 + $0x6] sm:$0x3] }
  0xe4   : > { %417 = vst.msk [vmem:[#allocation2 + $0x20] sm:$0xff] %vm392_vm0, %v384_v31  ;;  %v367_v32 = vpop.permute.xlu1 %366 }
  0xe5   : > { %v387_v33 = vmax.f32 %v347_v11, %v367_v32  ;;  %v363_v34 = vpop.permute.xlu0 %362  ;;  %v437_v11 = vld [vmem:[#allocation2 + $0x60] sm:$0xff] }
  0xe6   : > { %v385_v35 = vmax.f32 %v345_v12, %v363_v34  ;;  %v478_v15 = vrot.slane %v437_v11, 7 }
  0xe7   : > { %420 = vst.msk [vmem:[#allocation2 + $0x68] sm:$0xff] %vm392_vm0, %v387_v33 }
  0xe8   : > { %418 = vst.msk [vmem:[#allocation2 + $0x38] sm:$0xff] %vm392_vm0, %v385_v35  ;;  %v371_v36 = vpop.permute.xlu1 %370  ;;  %v484_v35 = vrot.slane %v443_v25, 7  ;;  %v826_v25 = vld [vmem:[#allocation2 + $0xc0] sm:$0xff] }
  0xe9   : > { %v389_v37 = vmax.f32 %v349_v20, %v371_v36  ;;  %v369_v38 = vpop.permute.xlu0 %368  ;;  %v427_v20 = vld [vmem:[#allocation2 + $0x10] sm:$0xff]  ;;  %v433_v36 = vld [vmem:[#allocation2 + $0x40] sm:$0xff] }
  0xea   : > { %v388_v40 = vmax.f32 %v348_v21, %v369_v38  ;;  %v4054_v46 = vld [vmem:[#allocation2 + $0x50] sm:$0xff]  ;;  %v430_v21 = vld [vmem:[#allocation2 + $0x28] sm:$0xff]  ;;  %v680_v32 = vrot.slane %v427_v20, 1  ;;  %v436_v38 = vld [vmem:[#allocation2 + $0x58] sm:$0xff] }
  0xeb   : > { %422 = vst.msk [vmem:[#allocation2 + $0x98] sm:$0xff] %vm392_vm0, %v389_v37  ;;  %v4049_v41 = vld [vmem:[#allocation2 + $0x20] sm:$0xff]  ;;  %v476_v9 = vrot.slane %v4054_v46, 7  ;;  %v683_v33 = vrot.slane %v430_v21, 1  ;;  %v688_v49 = vrot.slane %v4054_v46, 1  ;;  %v689_v50 = vrot.slane %v436_v38, 1 }
  0xec   : > { %421 = vst.msk [vmem:[#allocation2 + $0x80] sm:$0xff] %vm392_vm0, %v388_v40  ;;  %v375_v42 = vpop.permute.xlu1 %374  ;;  %v503_v43 = vpack.c.bf16 %v4049_v41, %v4046_v39  ;;  %v470_v55 = vrot.slane %v4049_v41, 7  ;;  %v682_v31 = vrot.slane %v4049_v41, 1  ;;  %v681_v39 = vsel %vm678_vm3, %v679_v30, %v680_v32  ;;  %v1371_v38 = vld [vmem:[#allocation7 + $0xe] sm:$0x3] }
  0xed   : > { %v391_v44 = vmax.f32 %v351_v26, %v375_v42  ;;  %v373_v45 = vpop.permute.xlu0 %372  ;;  %v4105_v17 = vsel %vm465_vm2, %v475_v8, %v476_v9  ;;  %v690_v62 = vsel %vm678_vm3, %v688_v49, %v689_v50  ;;  %v445_v9 = vld [vmem:[#allocation2 + $0xa0] sm:$0xff]  ;;  %v1505_v49 = vld [vmem:[#allocation7 + $0x10] sm:$0x3] }
  0xee   : > { %v390_v47 = vmax.f32 %v350_v27, %v373_v45  ;;  %3180 = vmatprep.mubr.msk.bf16.mxu0 %vm392_vm0, %v503_v43  ;;  %v4070_v58 = vld [vmem:[#allocation2 + $0x68] sm:$0xff]  ;;  %v4083_v1 = vsel %vm465_vm2, %v469_v57, %v470_v55  ;;  %v4134_v40 = vsel %vm678_vm3, %v682_v31, %v683_v33  ;;  %v866_v31 = vrot.slane %v826_v25, 7 }
  0xef   : > { %424 = vst.msk [vmem:[#allocation2 + $0xc8] sm:$0xff] %vm392_vm0, %v391_v44  ;;  %v4058_v48 = vld [vmem:[#allocation2 + $0x38] sm:$0xff]  ;;  %v498_v10 = vpack.c.bf16 %v4083_v1, %v468_v63  ;;  %v479_v14 = vrot.slane %v4070_v58, 7  ;;  %v442_v43 = vld [vmem:[#allocation2 + $0x88] sm:$0xff]  ;;  %v686_v44 = vrot.slane %v433_v36, 1  ;;  %v691_v56 = vrot.slane %v4070_v58, 1 }
  0xf0   : > { %423 = vst.msk [vmem:[#allocation2 + $0xb0] sm:$0xff] %vm392_vm0, %v390_v47  ;;  %v4063_v51 = vpack.c.bf16 %v4054_v46, %v4058_v48  ;;  %v473_v7 = vrot.slane %v4058_v48, 7  ;;  %v685_v47 = vrot.slane %v4058_v48, 1  ;;  %v695_v55 = vrot.slane %v442_v43, 1  ;;  %v1110_v33 = vld [vmem:[#allocation7 + $0xa] sm:$0x3] }
  0xf1   : > { %v4116_v24 = vsel %vm465_vm2, %v478_v15, %v479_v14  ;;  %v698_v15 = vrot.slane %v445_v9, 1  ;;  %v1385_v43 = vsel %vm521_vm1, %v1371_v38, 0 }
  0xf2   : > { %3181 = vmatmul.mubr.msk.bf16.vlgmr.msra.gmra.mrb[0].mxu0 %vm392_vm0, %v4063_v51  ;;  %v4085_v2 = vld [vmem:[#allocation2 + $0x98] sm:$0xff]  ;;  %v4102_v16 = vsel %vm465_vm2, %v472_v5, %v473_v7  ;;  %v687_v61 = vsel %vm678_vm3, %v685_v47, %v686_v44  ;;  %v896_v7 = vsel %vm521_vm1, %v882_v29, 0 }
  0xf3   : > { %3189 = vmatpush3.bf16.msra.mxu0 %v603_v52  ;;  %v4072_v59 = vld [vmem:[#allocation2 + $0x80] sm:$0xff]  ;;  %v4112_v22 = vpack.c.bf16 %v4105_v17, %v4102_v16  ;;  %v485_v34 = vrot.slane %v4085_v2, 7  ;;  %v711_v52 = vpack.c.bf16 %v4134_v40, %v681_v39  ;;  %v4150_v5 = vpack.c.bf16 %v690_v62, %v687_v61 }
  0xf4   : > { %v4076_v60 = vpack.c.bf16 %v4072_v59, %v4070_v58  ;;  %3488 = vmatprep.subr.msk.bf16.mxu0 %vm521_vm1, %v716_v53  ;;  %v482_v12 = vrot.slane %v4072_v59, 7  ;;  %v439_v53 = vld [vmem:[#allocation2 + $0x70] sm:$0xff]  ;;  %v694_v54 = vrot.slane %v4072_v59, 1  ;;  %v697_v14 = vrot.slane %v4085_v2, 1 }
  0xf5   : > { %v486_v42 = vsel %vm465_vm2, %v484_v35, %v485_v34  ;;  %v692_v57 = vrot.slane %v439_v53, 1  ;;  %v973_v34 = vpack.c.bf16 %v4085_v2, %v4072_v59  ;;  %v1277_v35 = vld [vmem:[#allocation7 + $0xc] sm:$0x3] }
  0xf6   : > { %3184 = vmatprep.mubr.msk.bf16.mxu0 %vm392_vm0, %v4076_v60  ;;  %v4108_v18 = vsel %vm465_vm2, %v481_v13, %v482_v12  ;;  %v696_v63 = vsel %vm678_vm3, %v694_v54, %v695_v55  ;;  %v701_v12 = vrot.slane %v448_v4, 1  ;;  %v976_v13 = vld [vmem:[#allocation7 + $0x8] sm:$0x3]  ;;  %v699_v20 = vsel %vm678_vm3, %v697_v14, %v698_v15 }
  0xf7   : > { %v4087_v3 = vld [vmem:[#allocation2 + $0xb0] sm:$0xff]  ;;  %v4121_v27 = vpack.c.bf16 %v4108_v18, %v4116_v24  ;;  %v693_v8 = vsel %vm678_vm3, %v691_v56, %v692_v57  ;;  %v879_v30 = vpack.c.bf16 %v486_v42, %v4108_v18  ;;  %v972_v18 = vpack.c.bf16 %v4070_v58, %v4054_v46  ;;  %v3041_v57 = vld [vmem:[%s4546_s2] ss:$0 sm:$0xff] }
  0xf8   : > { %v4091_v6 = vpack.c.bf16 %v4087_v3, %v4085_v2  ;;  %v488_v26 = vrot.slane %v4087_v3, 7  ;;  %v4155_v11 = vpack.c.bf16 %v696_v63, %v693_v8  ;;  %v828_v46 = vld [vmem:[#allocation2 + $0xd0] sm:$0xff]  ;;  %v1106_v58 = vpack.c.bf16 %v693_v8, %v690_v62  ;;  %v3042_v62 = vld [vmem:[%s4547_s3] ss:$0 sm:$0xff] }
  0xf9   : > { %v1291_v59 = vsel %vm521_vm1, %v1277_v35, 0  ;;  %v1107_v2 = vpack.c.bf16 %v699_v20, %v696_v63  ;;  %v1741_v56 = vld [vmem:[#allocation9] sm:$0xf] }
  0xfa   : > { %3185 = vmatmul.mubr.msk.bf16.gmra.mrb[4].mxu0 %vm392_vm0, %v4091_v6  ;;  %v489_v37 = vsel %vm465_vm2, %v487_v28, %v488_v26  ;;  %v4172_v26 = vld [vmem:[#allocation2 + $0xc8] sm:$0xff]  ;;  %v878_v28 = vpack.c.bf16 %v4116_v24, %v4105_v17  ;;  %v971_v17 = vpack.c.bf16 %v4058_v48, %v4049_v41  ;;  %v1124_v24 = vsel %vm521_vm1, %v1110_v33, 0 }
  0xfb   : > { %3190 = vmatprep.mubr.msk.bf16.mxu0 %vm392_vm0, %v498_v10  ;;  %v4137_v45 = vpack.c.bf16 %v489_v37, %v486_v42  ;;  %v700_v10 = vrot.slane %v4087_v3, 1  ;;  %v867_v32 = vrot.slane %v4172_v26, 7  ;;  %v974_v41 = vpack.c.bf16 %v4172_v26, %v4087_v3  ;;  %v1222_v42 = vld [vmem:[#allocation2 + $0xe0] sm:$0xff] }
  0xfc   : > { %v1105_v48 = vpack.c.bf16 %v687_v61, %v4134_v40  ;;  %v1094_v36 = vrot.slane %v4172_v26, 1  ;;  %v1221_v40 = vld [vmem:[#allocation2 + $0xd8] sm:$0xff]  ;;  %v1262_v47 = vrot.slane %v1222_v42, 7  ;;  %v1489_v53 = vrot.slane %v1222_v42, 1 }
  0xfd   : > { %v702_v19 = vsel %vm678_vm3, %v700_v10, %v701_v12  ;;  %v1261_v44 = vrot.slane %v1221_v40, 7 }
  0xfe   : > { %v4165_v21 = vpack.c.bf16 %v702_v19, %v699_v20 }
  0xff   : > { %v1263_v50 = vsel %vm465_vm2, %v1261_v44, %v1262_v47  ;;  %v1671_v47 = vld [vmem:[#allocation3 + $0x30] sm:$0xff] }
 0x102   : > { %3191 = vmatmul.mubr.msk.bf16.vlgmr.msra.gmra.mrb[0].mxu0 %vm392_vm0, %v4112_v22 }
 0x103   : > { %3199 = vmatpush3.bf16.msra.mxu0 %v730_v23  ;;  %3194 = vmatprep.mubr.msk.bf16.mxu0 %vm392_vm0, %v4121_v27  ;;  %v877_v23 = vpack.c.bf16 %v4102_v16, %v4083_v1  ;;  %v868_v1 = vsel %vm465_vm2, %v866_v31, %v867_v32 }
 0x104   : > { %3489 = vmatprep.subr.msk.bf16.mxu0 %vm521_vm1, %v882_v29  ;;  %v990_v29 = vsel %vm521_vm1, %v976_v13, 0  ;;  %v880_v16 = vpack.c.bf16 %v868_v1, %v489_v37  ;;  %v1095_v37 = vrot.slane %v828_v46, 1  ;;  %v1665_v46 = vld [vmem:[#allocation3] sm:$0xff] }
 0x105   : > { %v1705_v40 = vrot.slane %v1665_v46, 7  ;;  %v1679_v46 = vld [vmem:[#allocation3 + $0x70] sm:$0xff] }
 0x106   : > { %v1096_v3 = vsel %vm678_vm3, %v1094_v36, %v1095_v37  ;;  %v1842_v37 = vsel %vm1760_vm5, %v1741_v56, 0 }
 0x107   : > { %v1108_v39 = vpack.c.bf16 %v1096_v3, %v702_v19 }
 0x10a   : > { %3195 = vmatmul.mubr.msk.bf16.gmra.mrb[4].mxu0 %vm392_vm0, %v4137_v45 }
 0x10b   : > { %3200 = vmatprep.mubr.msk.bf16.mxu0 %vm392_vm0, %v711_v52  ;;  %v1275_v52 = vpack.c.bf16 %v1263_v50, %v868_v1 }
 0x112   : > { %3201 = vmatmul.mubr.msk.bf16.vlgmr.msra.gmra.mrb[0].mxu0 %vm392_vm0, %v4150_v5 }
 0x113   : > { %3209 = vmatpush3.bf16.msra.mxu0 %v896_v7  ;;  %3204 = vmatprep.mubr.msk.bf16.mxu0 %vm392_vm0, %v4155_v11 }
 0x114   : > { %3490 = vmatprep.subr.msk.bf16.mxu0 %vm521_vm1, %v976_v13 }
 0x11a   : > { %3205 = vmatmul.mubr.msk.bf16.gmra.mrb[4].mxu0 %vm392_vm0, %v4165_v21 }
 0x11b   : > { %3210 = vmatprep.mubr.msk.bf16.mxu0 %vm392_vm0, %v877_v23 }
 0x122   : > { %3211 = vmatmul.mubr.msk.bf16.vlgmr.msra.gmra.mrb[0].mxu0 %vm392_vm0, %v878_v28 }
 0x123   : > { %3219 = vmatpush3.bf16.msra.mxu0 %v990_v29  ;;  %3214 = vmatprep.mubr.msk.bf16.mxu0 %vm392_vm0, %v879_v30 }
 0x124   : > { %3491 = vmatprep.subr.msk.bf16.mxu0 %vm521_vm1, %v1110_v33 }
 0x12a   : > { %3215 = vmatmul.mubr.msk.bf16.gmra.mrb[4].mxu0 %vm392_vm0, %v880_v16 }
 0x12b   : > { %3220 = vmatprep.mubr.msk.bf16.mxu0 %vm392_vm0, %v971_v17  ;;  %v4291_v17 = vld [vmem:[#allocation3 + $0x8] sm:$0xff] }
 0x132   : > { %3221 = vmatmul.mubr.msk.bf16.vlgmr.msra.gmra.mrb[0].mxu0 %vm392_vm0, %v972_v18 }
 0x133   : > { %3229 = vmatpush3.bf16.msra.mxu0 %v1124_v24  ;;  %3224 = vmatprep.mubr.msk.bf16.mxu0 %vm392_vm0, %v973_v34 }
 0x134   : > { %3492 = vmatprep.subr.msk.bf16.mxu0 %vm521_vm1, %v1277_v35 }
 0x13a   : > { %3225 = vmatmul.mubr.msk.bf16.gmra.mrb[4].mxu0 %vm392_vm0, %v974_v41 }
 0x13b   : > { %3230 = vmatprep.mubr.msk.bf16.mxu0 %vm392_vm0, %v1105_v48 }
 0x142   : > { %3231 = vmatmul.mubr.msk.bf16.vlgmr.msra.gmra.mrb[0].mxu0 %vm392_vm0, %v1106_v58 }
 0x143   : > { %3239 = vmatpush3.bf16.msra.mxu0 %v1291_v59  ;;  %3234 = vmatprep.mubr.msk.bf16.mxu0 %vm392_vm0, %v1107_v2  ;;  %v1668_v2 = vld [vmem:[#allocation3 + $0x18] sm:$0xff] }
 0x144   : > { %3493 = vmatprep.subr.msk.bf16.mxu0 %vm521_vm1, %v1371_v38  ;;  %v1954_v38 = vld [vmem:[#allocation9 + $0x8] sm:$0xf] }
 0x14a   : > { %3235 = vmatmul.mubr.msk.bf16.gmra.mrb[4].mxu0 %vm392_vm0, %v1108_v39 }
 0x14b   : > { %3240 = vmatprep.mubr.msk.bf16.mxu0 %vm392_vm0, %v4112_v22  ;;  %v1519_v22 = vsel %vm521_vm1, %v1505_v49, 0 }
 0x152   : > { %3241 = vmatmul.mubr.msk.bf16.vlgmr.msra.gmra.mrb[0].mxu0 %vm392_vm0, %v4121_v27  ;;  %v1369_v27 = vpack.c.bf16 %v1222_v42, %v4172_v26  ;;  %v1708_v42 = vrot.slane %v1668_v2, 7 }
 0x153   : > { %3249 = vmatpush3.bf16.msra.mxu0 %v1385_v43  ;;  %3244 = vmatprep.mubr.msk.bf16.mxu0 %vm392_vm0, %v4137_v45  ;;  %v1223_v45 = vld [vmem:[#allocation2 + $0xe8] sm:$0xff] }
 0x154   : > { %3494 = vmatprep.subr.msk.bf16.mxu0 %vm521_vm1, %v1505_v49  ;;  %v1490_v54 = vrot.slane %v1223_v45, 1  ;;  %v1680_v45 = vld [vmem:[#allocation3 + $0x78] sm:$0xff] }
 0x15a   : > { %3245 = vmatmul.mubr.msk.bf16.gmra.mrb[4].mxu0 %vm392_vm0, %v1275_v52 }
 0x15b   : > { %3250 = vmatprep.mubr.msk.bf16.mxu0 %vm392_vm0, %v4063_v51  ;;  %v1491_v51 = vsel %vm678_vm3, %v1489_v53, %v1490_v54  ;;  %v1674_v53 = vld [vmem:[#allocation3 + $0x48] sm:$0xff] }
 0x162   : > { %3251 = vmatmul.mubr.msk.bf16.vlgmr.msra.gmra.mrb[0].mxu0 %vm392_vm0, %v4076_v60  ;;  %v1503_v60 = vpack.c.bf16 %v1491_v51, %v1096_v3  ;;  %v1706_v3 = vrot.slane %v4291_v17, 7  ;;  %v1711_v51 = vrot.slane %v1671_v47, 7 }
 0x163   : > { %3259 = vmatpush3.bf16.msra.mxu0 %v1519_v22  ;;  %3254 = vmatprep.mubr.msk.bf16.mxu0 %vm392_vm0, %v4091_v6  ;;  %v1747_v6 = vld [vmem:[#allocation9 + $0x4] sm:$0xf] }
 0x164   : > { %3495 = vmatprep.subr.msk.bf16.mxu1 %vm1760_vm5, %v1747_v6  ;;  %v1762_v55 = vsel %vm1760_vm5, %v1747_v6, 0  ;;  %v1707_v50 = vsel %vm465_vm2, %v1705_v40, %v1706_v3  ;;  %v1930_v40 = vrot.slane %v1679_v46, 1 }
 0x165   : > { %3269 = vmatpush3.bf16.msra.mxu1 %v1762_v55  ;;  %v1677_v55 = vld [vmem:[#allocation3 + $0x60] sm:$0xff] }
 0x166   : > { %3496 = vmatprep.subr.msk.bf16.mxu1 %vm1760_vm5, %v1741_v56 }
 0x16a   : > { %3255 = vmatmul.mubr.msk.bf16.gmra.mrb[4].mxu0 %vm392_vm0, %v1369_v27 }
 0x16b   : > { %3260 = vmatprep.mubr.msk.bf16.mxu0 %vm392_vm0, %v4150_v5 }
 0x172   : > { %3261 = vmatmul.mubr.msk.bf16.vlgmr.msra.gmra.mrb[0].mxu0 %vm392_vm0, %v4155_v11 }
 0x173   : > { %3264 = vmatprep.mubr.msk.bf16.mxu0 %vm392_vm0, %v4165_v21 }
 0x17a   : > { %3265 = vmatmul.mubr.msk.bf16.gmra.mrb[4].mxu0 %vm392_vm0, %v1503_v60 }
 0x245   : > { %v3262_v61 = vpop.f32.mrb[0].mxu0 }
 0x246   : > { %v1603_v0 = vmul.f32 %v3262_v61, %v3041_v57  ;;  %v1555_v63 = vpop.f32.mrb[1].mxu0  ;;  %v1714_v61 = vrot.slane %v1674_v53, 7 }
 0x247   : > { %v1601_v4 = vmul.f32 %v3041_v57, %v1555_v63  ;;  %v3263_v5 = vpop.f32.mrb[2].mxu0  ;;  %v1717_v63 = vrot.slane %v1677_v55, 7 }
 0x248   : > { %v1618_v7 = vadd.f32 %v3042_v62, %v1603_v0  ;;  %v1604_v8 = vmul.f32 %v3263_v5, %v3041_v57  ;;  %v1558_v9 = vpop.f32.mrb[3].mxu0 }
 0x249   : > { %v1616_v10 = vadd.f32 %v3042_v62, %v1601_v4  ;;  %v1602_v11 = vmul.f32 %v3041_v57, %v1558_v9  ;;  %v1667_v9 = vld [vmem:[#allocation3 + $0x10] sm:$0xff] }
 0x24a   : > { %v1626_v12 = vmax.f32 %v1618_v7, 0.0  ;;  %v1619_v13 = vadd.f32 %v3042_v62, %v1604_v8  ;;  %v1683_v7 = vld [vmem:[#allocation3 + $0x90] sm:$0xff] }
 0x24b   : > { %v1624_v14 = vmax.f32 %v1616_v10, 0.0  ;;  %v1617_v15 = vadd.f32 %v3042_v62, %v1602_v11  ;;  %v1670_v10 = vld [vmem:[#allocation3 + $0x28] sm:$0xff] }
 0x24c   : > { %1659 = vst.msk [vmem:[#allocation3 + $0x50] sm:$0xff] %vm1632_vm4, %v1626_v12  ;;  %v1627_v19 = vmax.f32 %v1619_v13, 0.0  ;;  %v1968_v12 = vsel %vm1760_vm5, %v1954_v38, 0 }
 0x24d   : > { %1657 = vst.msk [vmem:[#allocation3 + $0x20] sm:$0xff] %vm1632_vm4, %v1624_v14  ;;  %v1625_v20 = vmax.f32 %v1617_v15, 0.0  ;;  %v3266_v21 = vpop.f32.mrb[4].mxu0  ;;  %v1686_v14 = vld [vmem:[#allocation3 + $0xa8] sm:$0xff] }
 0x24e   : > { %1660 = vst.msk [vmem:[#allocation3 + $0x68] sm:$0xff] %vm1632_vm4, %v1627_v19  ;;  %v1607_v23 = vmul.f32 %v3266_v21, %v3041_v57  ;;  %v1571_v25 = vpop.f32.mrb[5].mxu0  ;;  %v2120_v21 = vld [vmem:[#allocation9 + $0xc] sm:$0xf] }
 0x24f   : > { %1658 = vst.msk [vmem:[#allocation3 + $0x38] sm:$0xff] %vm1632_vm4, %v1625_v20  ;;  %v1605_v26 = vmul.f32 %v3041_v57, %v1571_v25  ;;  %v3267_v28 = vpop.f32.mrb[6].mxu0  ;;  %v1723_v20 = vrot.slane %v1683_v7, 7 }
 0x250   : > { %v1622_v29 = vadd.f32 %v3042_v62, %v1607_v23  ;;  %v1608_v30 = vmul.f32 %v3267_v28, %v3041_v57  ;;  %v1574_v31 = vpop.f32.mrb[7].mxu0  ;;  %v1917_v23 = vrot.slane %v4291_v17, 1  ;;  %v1921_v28 = vrot.slane %v1670_v10, 1 }
 0x251   : > { %v1620_v32 = vadd.f32 %v3042_v62, %v1605_v26  ;;  %v1606_v33 = vmul.f32 %v3041_v57, %v1574_v31  ;;  %v1720_v57 = vrot.slane %v1680_v45, 7  ;;  %v1918_v26 = vrot.slane %v1667_v9, 1 }
 0x252   : > { %v1630_v1 = vmax.f32 %v1622_v29, 0.0  ;;  %v1623_v16 = vadd.f32 %v3042_v62, %v1608_v30  ;;  %v1726_v30 = vrot.slane %v1686_v14, 7 }
 0x253   : > { %v1628_v18 = vmax.f32 %v1620_v32, 0.0  ;;  %v1621_v24 = vadd.f32 %v3042_v62, %v1606_v33  ;;  %v4302_v59 = vld [vmem:[#allocation3 + $0x50] sm:$0xff]  ;;  %v1673_v32 = vld [vmem:[#allocation3 + $0x40] sm:$0xff]  ;;  %v1919_v33 = vsel %vm678_vm3, %v1917_v23, %v1918_v26 }
 0x254   : > { %1663 = vst.msk [vmem:[#allocation3 + $0xb0] sm:$0xff] %vm1632_vm4, %v1630_v1  ;;  %v1631_v34 = vmax.f32 %v1623_v16, 0.0  ;;  %v4294_v35 = vld [vmem:[#allocation3 + $0x20] sm:$0xff]  ;;  %v1715_v62 = vrot.slane %v4302_v59, 7  ;;  %v2348_v26 = vld [vmem:[#allocation9 + $0x14] sm:$0xf] }
 0x255   : > { %1661 = vst.msk [vmem:[#allocation3 + $0x80] sm:$0xff] %vm1632_vm4, %v1628_v18  ;;  %v1629_v41 = vmax.f32 %v1621_v24, 0.0  ;;  %v1742_v48 = vpack.c.bf16 %v4294_v35, %v4291_v17  ;;  %v1709_v39 = vrot.slane %v4294_v35, 7  ;;  %v4316_v43 = vld [vmem:[#allocation3 + $0x68] sm:$0xff]  ;;  %v1920_v25 = vrot.slane %v4294_v35, 1  ;;  %v1676_v18 = vld [vmem:[#allocation3 + $0x58] sm:$0xff] }
 0x256   : > { %1664 = vst.msk [vmem:[#allocation3 + $0xc8] sm:$0xff] %vm1632_vm4, %v1631_v34  ;;  %v4300_v58 = vld [vmem:[#allocation3 + $0x38] sm:$0xff]  ;;  %v1718_v0 = vrot.slane %v4316_v43, 7  ;;  %v4353_v8 = vsel %vm465_vm2, %v1714_v61, %v1715_v62  ;;  %v1682_v17 = vld [vmem:[#allocation3 + $0x88] sm:$0xff]  ;;  %v1927_v3 = vrot.slane %v1676_v18, 1 }
 0x257   : > { %1662 = vst.msk [vmem:[#allocation3 + $0x98] sm:$0xff] %vm1632_vm4, %v1629_v41  ;;  %3270 = vmatprep.mubr.msk.bf16.mxu1 %vm1632_vm4, %v1742_v48  ;;  %v4308_v36 = vpack.c.bf16 %v4302_v59, %v4300_v58  ;;  %v4326_v52 = vsel %vm465_vm2, %v1708_v42, %v1709_v39  ;;  %v1712_v60 = vrot.slane %v4300_v58, 7  ;;  %v4379_v1 = vsel %vm678_vm3, %v1920_v25, %v1921_v28  ;;  %v2214_v61 = vld [vmem:[#allocation9 + $0x10] sm:$0xf] }
 0x258   : > { %v1737_v6 = vpack.c.bf16 %v4326_v52, %v1707_v50  ;;  %v4361_v13 = vsel %vm465_vm2, %v1717_v63, %v1718_v0  ;;  %v1923_v34 = vrot.slane %v4300_v58, 1  ;;  %v1924_v41 = vrot.slane %v1673_v32, 1  ;;  %v1685_v50 = vld [vmem:[#allocation3 + $0xa0] sm:$0xff] }
 0x259   : > { %3271 = vmatmul.mubr.msk.bf16.vlgmr.msra.gmra.mrb[0].mxu1 %vm1632_vm4, %v4308_v36  ;;  %v4347_v4 = vsel %vm465_vm2, %v1711_v51, %v1712_v60  ;;  %v1949_v48 = vpack.c.bf16 %v4379_v1, %v1919_v33  ;;  %v1929_v39 = vrot.slane %v4316_v43, 1  ;;  %v2134_v51 = vsel %vm1760_vm5, %v2120_v21, 0  ;;  %v2609_v32 = vld [vmem:[#allocation9 + $0x1c] sm:$0xf] }
 0x25a   : > { %3279 = vmatpush3.bf16.msra.mxu1 %v1842_v37  ;;  %v4357_v11 = vpack.c.bf16 %v4353_v8, %v4347_v4  ;;  %v1933_v37 = vrot.slane %v1682_v17, 1  ;;  %v1925_v42 = vsel %vm678_vm3, %v1923_v34, %v1924_v41  ;;  %v2115_v10 = vpack.c.bf16 %v4347_v4, %v4326_v52  ;;  %v2743_v41 = vld [vmem:[#allocation9 + $0x20] sm:$0xf] }
 0x25b   : > { %3497 = vmatprep.subr.msk.bf16.mxu1 %vm1760_vm5, %v1954_v38  ;;  %v4330_v27 = vld [vmem:[#allocation3 + $0xb0] sm:$0xff]  ;;  %v1926_v38 = vrot.slane %v4302_v59, 1  ;;  %v1931_v60 = vsel %vm678_vm3, %v1929_v39, %v1930_v40  ;;  %v2623_v17 = vsel %vm1760_vm5, %v2609_v32, 0 }
 0x25c   : > { %v4318_v44 = vld [vmem:[#allocation3 + $0x80] sm:$0xff]  ;;  %v1727_v29 = vrot.slane %v4330_v27, 7  ;;  %v1938_v62 = vrot.slane %v4330_v27, 1 }
 0x25d   : > { %v4322_v49 = vpack.c.bf16 %v4318_v44, %v4316_v43  ;;  %v1721_v56 = vrot.slane %v4318_v44, 7  ;;  %v1932_v2 = vrot.slane %v4318_v44, 1  ;;  %v1928_v45 = vsel %vm678_vm3, %v1926_v38, %v1927_v3  ;;  %v4417_v14 = vld [vmem:[#allocation3 + $0xc8] sm:$0xff]  ;;  %v3080_v3 = vld [vmem:[%s4550_s6] ss:$0 sm:$0xff] }
 0x25e   : > { %v4328_v22 = vld [vmem:[#allocation3 + $0x98] sm:$0xff]  ;;  %v1728_v16 = vsel %vm465_vm2, %v1726_v30, %v1727_v29  ;;  %v4395_v53 = vpack.c.bf16 %v1928_v45, %v1925_v42  ;;  %v2105_v25 = vrot.slane %v4417_v14, 7  ;;  %v2332_v30 = vrot.slane %v4417_v14, 1 }
 0x25f   : > { %3274 = vmatprep.mubr.msk.bf16.mxu1 %vm1632_vm4, %v4322_v49  ;;  %v4336_v54 = vpack.c.bf16 %v4330_v27, %v4328_v22  ;;  %v4350_v5 = vsel %vm465_vm2, %v1720_v57, %v1721_v56  ;;  %v1724_v15 = vrot.slane %v4328_v22, 7  ;;  %v1934_v47 = vsel %vm678_vm3, %v1932_v2, %v1933_v37  ;;  %v2515_v29 = vld [vmem:[#allocation9 + $0x18] sm:$0xf] }
 0x260   : > { %v4366_v19 = vpack.c.bf16 %v4350_v5, %v4361_v13  ;;  %v1935_v55 = vrot.slane %v4328_v22, 1  ;;  %v4400_v56 = vpack.c.bf16 %v1934_v47, %v1931_v60  ;;  %v1936_v57 = vrot.slane %v1685_v50, 1 }
 0x261   : > { %3275 = vmatmul.mubr.msk.bf16.gmra.mrb[4].mxu1 %vm1632_vm4, %v4336_v54  ;;  %v1725_v31 = vsel %vm465_vm2, %v1723_v20, %v1724_v15  ;;  %v2116_v15 = vpack.c.bf16 %v4361_v13, %v4353_v8  ;;  %v2228_v20 = vsel %vm1760_vm5, %v2214_v61, 0  ;;  %v2209_v8 = vpack.c.bf16 %v4300_v58, %v4294_v35 }
 0x262   : > { %3280 = vmatprep.mubr.msk.bf16.mxu1 %vm1632_vm4, %v1737_v6  ;;  %v4382_v24 = vpack.c.bf16 %v1728_v16, %v1725_v31  ;;  %v1688_v6 = vld [vmem:[#allocation3 + $0xb8] sm:$0xff]  ;;  %v1937_v63 = vsel %vm678_vm3, %v1935_v55, %v1936_v57  ;;  %v2362_v13 = vsel %vm1760_vm5, %v2348_v26, 0  ;;  %v2211_v28 = vpack.c.bf16 %v4328_v22, %v4318_v44 }
 0x263   : > { %v1939_v0 = vrot.slane %v1688_v6, 1  ;;  %v2212_v35 = vpack.c.bf16 %v4417_v14, %v4330_v27  ;;  %v2343_v58 = vpack.c.bf16 %v1925_v42, %v4379_v1  ;;  %v2529_v44 = vsel %vm1760_vm5, %v2515_v29, 0  ;;  %v2459_v1 = vld [vmem:[#allocation3 + $0xd8] sm:$0xff] }
 0x264   : > { %v2345_v22 = vpack.c.bf16 %v1937_v63, %v1934_v47  ;;  %v2499_v18 = vrot.slane %v2459_v1, 7 }
 0x265   : > { %v1940_v7 = vsel %vm678_vm3, %v1938_v62, %v1939_v0 }
 0x266   : > { %v4410_v9 = vpack.c.bf16 %v1940_v7, %v1937_v63 }
 0x269   : > { %3281 = vmatmul.mubr.msk.bf16.vlgmr.msra.gmra.mrb[0].mxu1 %vm1632_vm4, %v4357_v11 }
 0x26a   : > { %3289 = vmatpush3.bf16.msra.mxu1 %v1968_v12  ;;  %3284 = vmatprep.mubr.msk.bf16.mxu1 %vm1632_vm4, %v4366_v19  ;;  %v2064_v12 = vld [vmem:[#allocation3 + $0xc0] sm:$0xff] }
 0x26b   : > { %3498 = vmatprep.subr.msk.bf16.mxu1 %vm1760_vm5, %v2120_v21  ;;  %v2117_v21 = vpack.c.bf16 %v1725_v31, %v4350_v5  ;;  %v2104_v23 = vrot.slane %v2064_v12, 7  ;;  %v2210_v5 = vpack.c.bf16 %v4316_v43, %v4302_v59  ;;  %v2066_v59 = vld [vmem:[#allocation3 + $0xd0] sm:$0xff]  ;;  %v2344_v43 = vpack.c.bf16 %v1931_v60, %v1928_v45 }
 0x26c   : > { %v2333_v31 = vrot.slane %v2066_v59, 1 }
 0x26d   : > { %v2106_v52 = vsel %vm465_vm2, %v2104_v23, %v2105_v25 }
 0x26e   : > { %v2118_v4 = vpack.c.bf16 %v2106_v52, %v1728_v16  ;;  %v2334_v27 = vsel %vm678_vm3, %v2332_v30, %v2333_v31  ;;  %v2460_v16 = vld [vmem:[#allocation3 + $0xe0] sm:$0xff] }
 0x26f   : > { %v2346_v33 = vpack.c.bf16 %v2334_v27, %v1940_v7  ;;  %v2500_v34 = vrot.slane %v2460_v16, 7  ;;  %v2727_v2 = vrot.slane %v2460_v16, 1 }
 0x271   : > { %3285 = vmatmul.mubr.msk.bf16.gmra.mrb[4].mxu1 %vm1632_vm4, %v4382_v24 }
 0x272   : > { %3290 = vmatprep.mubr.msk.bf16.mxu1 %vm1632_vm4, %v1949_v48  ;;  %v2501_v48 = vsel %vm465_vm2, %v2499_v18, %v2500_v34 }
 0x273   : > { %v2513_v46 = vpack.c.bf16 %v2501_v48, %v2106_v52 }
 0x279   : > { %3291 = vmatmul.mubr.msk.bf16.vlgmr.msra.gmra.mrb[0].mxu1 %vm1632_vm4, %v4395_v53 }
 0x27a   : > { %3299 = vmatpush3.bf16.msra.mxu1 %v2134_v51  ;;  %3294 = vmatprep.mubr.msk.bf16.mxu1 %vm1632_vm4, %v4400_v56 }
 0x27b   : > { %3499 = vmatprep.subr.msk.bf16.mxu1 %vm1760_vm5, %v2214_v61 }
 0x281   : > { %3295 = vmatmul.mubr.msk.bf16.gmra.mrb[4].mxu1 %vm1632_vm4, %v4410_v9 }
 0x282   : > { %3300 = vmatprep.mubr.msk.bf16.mxu1 %vm1632_vm4, %v2115_v10 }
 0x289   : > { %3301 = vmatmul.mubr.msk.bf16.vlgmr.msra.gmra.mrb[0].mxu1 %vm1632_vm4, %v2116_v15 }
 0x28a   : > { %3309 = vmatpush3.bf16.msra.mxu1 %v2228_v20  ;;  %3304 = vmatprep.mubr.msk.bf16.mxu1 %vm1632_vm4, %v2117_v21 }
 0x28b   : > { %3500 = vmatprep.subr.msk.bf16.mxu1 %vm1760_vm5, %v2348_v26 }
 0x291   : > { %3305 = vmatmul.mubr.msk.bf16.gmra.mrb[4].mxu1 %vm1632_vm4, %v2118_v4 }
 0x292   : > { %3310 = vmatprep.mubr.msk.bf16.mxu1 %vm1632_vm4, %v2209_v8 }
 0x299   : > { %3311 = vmatmul.mubr.msk.bf16.vlgmr.msra.gmra.mrb[0].mxu1 %vm1632_vm4, %v2210_v5 }
 0x29a   : > { %3319 = vmatpush3.bf16.msra.mxu1 %v2362_v13  ;;  %3314 = vmatprep.mubr.msk.bf16.mxu1 %vm1632_vm4, %v2211_v28 }
 0x29b   : > { %3501 = vmatprep.subr.msk.bf16.mxu1 %vm1760_vm5, %v2515_v29 }
 0x2a1   : > { %3315 = vmatmul.mubr.msk.bf16.gmra.mrb[4].mxu1 %vm1632_vm4, %v2212_v35 }
 0x2a2   : > { %3320 = vmatprep.mubr.msk.bf16.mxu1 %vm1632_vm4, %v2343_v58 }
 0x2a9   : > { %3321 = vmatmul.mubr.msk.bf16.vlgmr.msra.gmra.mrb[0].mxu1 %vm1632_vm4, %v2344_v43 }
 0x2aa   : > { %3329 = vmatpush3.bf16.msra.mxu1 %v2529_v44  ;;  %3324 = vmatprep.mubr.msk.bf16.mxu1 %vm1632_vm4, %v2345_v22 }
 0x2ab   : > { %3502 = vmatprep.subr.msk.bf16.mxu1 %vm1760_vm5, %v2609_v32 }
 0x2b1   : > { %3325 = vmatmul.mubr.msk.bf16.gmra.mrb[4].mxu1 %vm1632_vm4, %v2346_v33 }
 0x2b2   : > { %3330 = vmatprep.mubr.msk.bf16.mxu1 %vm1632_vm4, %v4357_v11  ;;  %v2757_v11 = vsel %vm1760_vm5, %v2743_v41, 0 }
 0x2b9   : > { %3331 = vmatmul.mubr.msk.bf16.vlgmr.msra.gmra.mrb[0].mxu1 %vm1632_vm4, %v4366_v19  ;;  %v2607_v19 = vpack.c.bf16 %v2460_v16, %v4417_v14 }
 0x2ba   : > { %3339 = vmatpush3.bf16.msra.mxu1 %v2623_v17  ;;  %3334 = vmatprep.mubr.msk.bf16.mxu1 %vm1632_vm4, %v4382_v24  ;;  %v2461_v24 = vld [vmem:[#allocation3 + $0xe8] sm:$0xff] }
 0x2bb   : > { %3503 = vmatprep.subr.msk.bf16.mxu1 %vm1760_vm5, %v2743_v41 }
 0x2c1   : > { %3335 = vmatmul.mubr.msk.bf16.gmra.mrb[4].mxu1 %vm1632_vm4, %v2513_v46 }
 0x2c2   : > { %3340 = vmatprep.mubr.msk.bf16.mxu1 %vm1632_vm4, %v4308_v36  ;;  %v2728_v36 = vrot.slane %v2461_v24, 1 }
 0x2c9   : > { %3341 = vmatmul.mubr.msk.bf16.vlgmr.msra.gmra.mrb[0].mxu1 %vm1632_vm4, %v4322_v49  ;;  %v2729_v49 = vsel %vm678_vm3, %v2727_v2, %v2728_v36 }
 0x2ca   : > { %3349 = vmatpush3.bf16.msra.mxu1 %v2757_v11  ;;  %3344 = vmatprep.mubr.msk.bf16.mxu1 %vm1632_vm4, %v4336_v54  ;;  %v2741_v37 = vpack.c.bf16 %v2729_v49, %v2334_v27  ;;  %v3079_v54 = vld [vmem:[%s4549_s5] ss:$0 sm:$0xff] }
 0x2d1   : > { %3345 = vmatmul.mubr.msk.bf16.gmra.mrb[4].mxu1 %vm1632_vm4, %v2607_v19 }
 0x2d2   : > { %3350 = vmatprep.mubr.msk.bf16.mxu1 %vm1632_vm4, %v4395_v53 }
 0x2d9   : > { %3351 = vmatmul.mubr.msk.bf16.vlgmr.msra.gmra.mrb[0].mxu1 %vm1632_vm4, %v4400_v56 }
 0x2da   : > { %3354 = vmatprep.mubr.msk.bf16.mxu1 %vm1632_vm4, %v4410_v9 }
 0x2e1   : > { %3355 = vmatmul.mubr.msk.bf16.gmra.mrb[4].mxu1 %vm1632_vm4, %v2741_v37 }
 0x3ac   : > { %v3352_v38 = vpop.f32.mrb[0].mxu1 }
 0x3ad   : > { %v2841_v39 = vmul.f32 %v3352_v38, %v3079_v54  ;;  %v2793_v40 = vpop.f32.mrb[1].mxu1 }
 0x3ae   : > { %v2839_v42 = vmul.f32 %v3079_v54, %v2793_v40  ;;  %v3353_v47 = vpop.f32.mrb[2].mxu1 }
 0x3af   : > { %v2856_v50 = vadd.f32 %v3080_v3, %v2841_v39  ;;  %v2842_v45 = vmul.f32 %v3353_v47, %v3079_v54  ;;  %v2796_v53 = vpop.f32.mrb[3].mxu1 }
 0x3b0   : > { %v2854_v51 = vadd.f32 %v3080_v3, %v2839_v42  ;;  %v2840_v60 = vmul.f32 %v3079_v54, %v2796_v53 }
 0x3b1   : > { %v2864_v6 = vmax.f32 %v2856_v50, 0.0  ;;  %v2857_v55 = vadd.f32 %v3080_v3, %v2842_v45 }
 0x3b2   : > { %v2862_v56 = vmax.f32 %v2854_v51, 0.0  ;;  %v2855_v57 = vadd.f32 %v3080_v3, %v2840_v60 }
 0x3b3   : > { %2872 = vst.msk [vmem:[%s325_s21 + $0x10] sm:$0xff] %vm1632_vm4, %v2864_v6  ;;  %v2865_v61 = vmax.f32 %v2857_v55, 0.0 }
 0x3b4   : > { %2870 = vst.msk [vmem:[%s325_s21] sm:$0xff] %vm1632_vm4, %v2862_v56  ;;  %v2863_v62 = vmax.f32 %v2855_v57, 0.0  ;;  %v3356_v0 = vpop.f32.mrb[4].mxu1 }
 0x3b5   : > { %2873 = vst.msk [vmem:[%s325_s21 + $0x18] sm:$0xff] %vm1632_vm4, %v2865_v61  ;;  %v2845_v63 = vmul.f32 %v3356_v0, %v3079_v54  ;;  %v2809_v7 = vpop.f32.mrb[5].mxu1 }
 0x3b6   : > { %2871 = vst.msk [vmem:[%s325_s21 + $0x8] sm:$0xff] %vm1632_vm4, %v2863_v62  ;;  %v2843_v9 = vmul.f32 %v3079_v54, %v2809_v7  ;;  %v3357_v10 = vpop.f32.mrb[6].mxu1 }
 0x3b7   : > { %v2860_v12 = vadd.f32 %v3080_v3, %v2845_v63  ;;  %v2846_v14 = vmul.f32 %v3357_v10, %v3079_v54  ;;  %v2812_v15 = vpop.f32.mrb[7].mxu1 }
 0x3b8   : > { %v2858_v20 = vadd.f32 %v3080_v3, %v2843_v9  ;;  %v2844_v21 = vmul.f32 %v3079_v54, %v2812_v15 }
 0x3b9   : > { %v2868_v23 = vmax.f32 %v2860_v12, 0.0  ;;  %v2861_v25 = vadd.f32 %v3080_v3, %v2846_v14 }
 0x3ba   : > { %v2866_v26 = vmax.f32 %v2858_v20, 0.0  ;;  %v2859_v52 = vadd.f32 %v3080_v3, %v2844_v21 }
 0x3bb   : > { %2876 = vst.msk [vmem:[%s325_s21 + $0x30] sm:$0xff] %vm1632_vm4, %v2868_v23  ;;  %v2869_v4 = vmax.f32 %v2861_v25, 0.0 }
 0x3bc   : > { %2874 = vst.msk [vmem:[%s325_s21 + $0x20] sm:$0xff] %vm1632_vm4, %v2866_v26  ;;  %v2867_v8 = vmax.f32 %v2859_v52, 0.0 }
 0x3bd   : > { %2877 = vst.msk [vmem:[%s325_s21 + $0x38] sm:$0xff] %vm1632_vm4, %v2869_v4 }
 0x3be   : > { %2875 = vst.msk [vmem:[%s325_s21 + $0x28] sm:$0xff] %vm1632_vm4, %v2867_v8 }
 0x3bf   : > { %3680 = shalt.err (!%p3677_p2)
}
 0x3c0   : > { %s3681_s19 = scalar_lea.hbm %s4495_s11, 1024  ;;  %s3685_s21 = scalar_lea.hbm %s4551_s7, 2048 }
 0x3c1   : > { %p3682_p13 = scmp.ne.s32.totalorder %s4495_s11, %s3681_s19  ;;  %p3686_p4 = scmp.lt.u32.totalorder %s4495_s11, %s4551_s7 }
 0x3c2   : > { %p3687_p7 = scmp.lt.u32.totalorder %s3685_s21, %s3681_s19  ;;  %p3689_p11 = scmp.lt.u32.totalorder %s3681_s19, %s4495_s11 }
 0x3c3   : > { %p3683_p6 = pnand %p3682_p13, %p4565_p0 }
 0x3c4   : > { %p3688_p8 = por %p3687_p7, %p3686_p4 }
 0x3c5   : > { %p3684_p10 = pneg %p3683_p6 }
 0x3c6   : > { %p3690_p1 = por %p3689_p11, %p3688_p8 }
 0x3c8   : > { %p3691_p3 = pnand %p3690_p1, %p3684_p10 }
 0x3ca   : > { %3694 = shalt.err (!%p3691_p3)
}
 0x3cb   : > { %s3751_s9 = smov 128   ;;  %s3752_s23 = smov 8  }
 0x3cc   : > { %3514 = dma.vmem_to_hbm [thread:$0]  (%p4565_p0), %s4497_s22, 1024, %s4495_s11, %s2879_s28, %s3751_s9, %s3751_s9, %s3752_s23  }
 0x3cd PF: > { %s2907_s29 = sand.u32 1, %s3725_s24   ;;  %p4566_p5 = scmp.ne.s32.totalorder %s4556_s8, 0 }
 0x3ce   : > { %p4567_p9 = scmp.ge.s32.totalorder %s3737_s27, 2  ;;  %s2908_s10 = scalar_lea.sflag [#allocation6], %s2907_s29 }
 0x3d0   : > { %p3528_p12 = pnand %p4567_p9, %p4566_p5 }
 0x3d2   : > { %3720 = dma.done.wait (!%p3528_p12), %s2908_s10, 1024  }
 0x3d3   : > { %3722 = vsyncadd (!%p3528_p12), %s2908_s10, 4294966272  ;;  %p21_p2 = scmp.ge.s32.totalorder %s3903_s13, 4   ;;  %s4568_s24 = smov %s3729_s25 }
 0x3d4   : > { %s4569_s25 = smov %s3733_s26  ;;  %s4570_s26 = smov %s3912_s17 }
 0x3d5   : > { %s4571_s27 = smov %s3903_s13  ;;  %23 = sbr.rel (!%p21_p2) target bundleno = 6 (0x6), region = 124 }
 0x3dc   :  { %2913 = vsyncpa [#allocation5], 1 }
 0x3dd   :  { %2915 = vsyncpa [#allocation5 + $0x1], 1 }
 0x3de   :  { %2916 = vsyncpa [#allocation8], 1 }
 0x3df   :  { %2917 = vsyncpa [#allocation6], 1 }
 0x3e0   :  { %2919 = vsyncpa [#allocation6 + $0x1], 1 }

</bundles_post_ra>
